<compile_context>
chip_gen: v7x
topology: tpu7x:2x2x1
jax: 0.10.0
libtpu: 0.0.40
codegen_flags: <defaults>
</compile_context>

<pallas_src>
from collections import namedtuple

import numpy as np
import jax
import jax.numpy as jnp
from jax import lax
from jax.experimental import pallas as pl
from jax.experimental.pallas import tpu as pltpu

Genotype = namedtuple("Genotype", "normal normal_concat reduce reduce_concat")

GENOTYPE = Genotype(
    normal=[
        ("sep_conv_3x3", 2, 0),
        ("skip_connect", 2, 1),
        ("max_pool_3x3", 3, 1),
        ("sep_conv_3x3", 3, 2),
    ],
    normal_concat=[2, 3],
    reduce=[],
    reduce_concat=[],
)

BN_EPS = 1e-5


# --------------------------- parameter construction --------------------------

def _bn_fold(gamma, beta):
    # eval-mode BN with running_mean = 0, running_var = 1
    return gamma / jnp.sqrt(1.0 + BN_EPS), beta


def init_relu_conv_bn(key, c_in, c_out):
    k1, k2, k3 = jax.random.split(key, 3)
    w = jax.random.normal(k1, (c_in, c_out), jnp.float32) / jnp.sqrt(c_in)
    gamma = 1.0 + 0.1 * jax.random.normal(k2, (c_out,), jnp.float32)
    beta = 0.1 * jax.random.normal(k3, (c_out,), jnp.float32)
    scale, bias = _bn_fold(gamma, beta)
    return {"w": w, "scale": scale, "bias": bias}


def init_sepconv_stage(key, c):
    k1, k2, k3, k4 = jax.random.split(key, 4)
    dw = jax.random.normal(k1, (3, 3, c), jnp.float32) / 3.0
    pw = jax.random.normal(k2, (c, c), jnp.float32) / jnp.sqrt(c)
    gamma = 1.0 + 0.1 * jax.random.normal(k3, (c,), jnp.float32)
    beta = 0.1 * jax.random.normal(k4, (c,), jnp.float32)
    scale, bias = _bn_fold(gamma, beta)
    return {"dw": dw, "pw": pw, "scale": scale, "bias": bias}


def init_op(key, name, c):
    if name == "sep_conv_3x3":
        k1, k2 = jax.random.split(key)
        return {"s1": init_sepconv_stage(k1, c), "s2": init_sepconv_stage(k2, c)}
    return {}  # skip_connect / max_pool_3x3 have no parameters


# ------------------- packing to lane-dense MXU matrices ----------------------
# Done in numpy so cached results stay concrete even if __call__ is jit-traced.
# BN scale is folded into the output columns of every packed matrix.
# TODO(synk): at C >= 32 the kron-packed matrices waste MXU work on zero
# blocks; switch to per-tap (C, C) matmuls with M = B*H*W there.

def _pack_conv1x1(w, scale, W):
    """(Cin, Cout) 1x1 conv (+BN scale) -> block-diagonal (W*Cin, W*Cout)
    matrix acting on the lane-dense (rows, W*C) layout."""
    ws = np.asarray(w, np.float32) * np.asarray(scale, np.float32)[None, :]
    return np.kron(np.eye(W, dtype=np.float32), ws)


def _pack_sepconv_stage(p, W):
    """Fold depthwise-3x3 * pointwise-1x1 * BN-scale into a single (W*C, 3*W*C)
    matrix [M0 | M1 | M2] such that
        out[h] = M0-part[h-1] + M1-part[h] + M2-part[h+1]   (zero-filled in H);
    the W-direction halo / zero padding is baked into the band structure."""
    dw = np.asarray(p["dw"], np.float32)                               # (3,3,C)
    pw = (np.asarray(p["pw"], np.float32)
          * np.asarray(p["scale"], np.float32)[None, :])               # (C,C)
    C = pw.shape[1]
    shifts = [np.eye(W, k=1, dtype=np.float32),    # dx = 0 (input column w-1)
              np.eye(W, dtype=np.float32),         # dx = 1 (centre)
              np.eye(W, k=-1, dtype=np.float32)]   # dx = 2 (input column w+1)
    mats = []
    for dy in range(3):
        m = np.zeros((W * C, W * C), np.float32)
        for dx in range(3):
            a = dw[dy, dx][:, None] * pw
            m += np.kron(shifts[dx], a)
        mats.append(m)
    return np.concatenate(mats, axis=1)            # (W*C, 3*W*C)


# ------------------------------ fused kernel ---------------------------------

def _make_cell_kernel(prog, C, WC, H):
    """Fused cell kernel.  `prog` carries the genotype dataflow plus static
    column offsets into the packed weight slab / bias table."""

    def kernel(s0_ref, s1_ref, w_ref, b_ref, out_ref):
        M = s0_ref.shape[0]                     # B * H rows (image-major)

        # Hoisted, loop-invariant masks for per-image halo handling.
        row = lax.broadcasted_iota(jnp.int32, (M, WC), 0) % H
        row_first = row == 0                    # no h-1 neighbour in this image
        row_last = row == H - 1                 # no h+1 neighbour
        lane = lax.broadcasted_iota(jnp.int32, (M, WC), 1)
        lane_lo = lane < C                      # w == 0     (no w-1 neighbour)
        lane_hi = lane >= WC - C                # w == W-1   (no w+1 neighbour)

        def roll(y, shift, axis):
            # pltpu.roll follows jnp.roll semantics; normalize to a positive
            # static shift.
            return pltpu.roll(y, shift % y.shape[axis], axis=axis)

        def matmul(x, off, width):
            # (M, WC) @ (WC, width) lane-dense MXU matmul against a static,
            # 128-aligned column slice of the packed weight slab.
            return jnp.dot(x, w_ref[:, off:off + width],
                           preferred_element_type=jnp.float32)

        def add_bias(y, bi):
            return y + b_ref[bi:bi + 1, :]

        def relu_conv_bn(x, pp):
            return add_bias(matmul(jnp.maximum(x, 0.0), pp["off"], WC),
                            pp["bias"])

        def shift_up(y, fill):     # out[r] = y[r+1] within each image
            return jnp.where(row_last, fill, roll(y, -1, 0))

        def shift_down(y, fill):   # out[r] = y[r-1] within each image
            return jnp.where(row_first, fill, roll(y, 1, 0))

        def sepconv_stage(x, st):
            xr = jnp.maximum(x, 0.0)
            y = matmul(xr, st["off"], 3 * WC)          # one wide MXU matmul
            y0 = y[:, 0:WC]                             # lane-aligned slices
            y1 = y[:, WC:2 * WC]
            y2 = y[:, 2 * WC:3 * WC]
            out = shift_down(y0, 0.0) + y1 + shift_up(y2, 0.0)
            return add_bias(out, st["bias"])

        def sep_conv_3x3(x, pp):
            return sepconv_stage(sepconv_stage(x, pp["s1"]), pp["s2"])

        def max_pool_3x3(x):
            neg = float("-inf")
            right = jnp.where(lane_hi, neg, roll(x, -C, 1))   # neighbour w+1
            left = jnp.where(lane_lo, neg, roll(x, C, 1))     # neighbour w-1
            m = jnp.maximum(x, jnp.maximum(left, right))
            down = jnp.where(row_last, neg, roll(m, -1, 0))   # neighbour h+1
            up = jnp.where(row_first, neg, roll(m, 1, 0))     # neighbour h-1
            return jnp.maximum(m, jnp.maximum(up, down))

        def apply_op(name, pp, x):
            if name == "skip_connect":
                return x
            if name == "max_pool_3x3":
                return max_pool_3x3(x)
            if name == "sep_conv_3x3":
                return sep_conv_3x3(x, pp)
            raise NotImplementedError(name)

        states = {"0": relu_conv_bn(s0_ref[...], prog["pre0"]),
                  "1": relu_conv_bn(s1_ref[...], prog["pre1"])}
        for to_i, ops in prog["ops"].items():
            acc = None
            for from_i, op_list in ops.items():
                if from_i not in states:
                    continue
                for name, pp in op_list:
                    y = apply_op(name, pp, states[from_i])
                    acc = y if acc is None else acc + y
            states[to_i] = acc

        # Fused "concat": each node state goes to its own 128-lane-aligned slab
        # of the (M, n_cat*WC) output block (lane-dense, unmasked stores).
        for si, st in enumerate(list(states.values())[2:]):
            out_ref[:, si * WC:(si + 1) * WC] = st

    return kernel


# --------------------------- layout conversion helpers -----------------------
# When stacking cells, keep activations lane-dense between cells; each of these
# conversions is a full HBM round trip of the activations.

def nchw_to_lane_dense(x_nchw):
    N, C, H, W = x_nchw.shape
    return jnp.transpose(x_nchw, (0, 2, 3, 1)).reshape(N, H, W * C)


# --------------------------------- the cell ----------------------------------

class DCOCellPallas:
    def __init__(self, genotype, C_prev_prev, C_prev, C, reduction,
                 reduction_prev, key):
        # TODO(synk): FactorizedReduce / stride-2 reduction ops not implemented;
        # only the reduction=False, reduction_prev=False configuration is supported.
        assert not reduction and not reduction_prev
        # TODO(synk): the lane-dense packing assumes equal channel counts.
        assert C_prev_prev == C_prev == C
        self.C = C
        k0, k1, kops = jax.random.split(key, 3)
        self.pre0 = init_relu_conv_bn(k0, C_prev_prev, C)
        self.pre1 = init_relu_conv_bn(k1, C_prev, C)
        op_names, tos, froms = zip(*genotype.normal)
        self._ops = {}   # str(to) -> {str(from): [(name, params), ...]}
        op_keys = jax.random.split(kops, len(op_names))
        for k, name_i, to_i, from_i in zip(op_keys, op_names, tos, froms):
            self._ops.setdefault(str(to_i), {}).setdefault(str(from_i), []).append(
                (name_i, init_op(k, name_i, C)))
        self.multiplier = len(self._ops)
        self._packed = {}   # keyed by spatial width W

    # -- pack all weights into one (WC, Ktot) slab + (n_bias, WC) bias table --
    def _get_packed(self, W):
        if W in self._packed:
            return self._packed[W]
        cols, biases = [], []

        def add_mat(m):
            off = sum(c.shape[1] for c in cols)
            cols.append(np.asarray(m, np.float32))
            return off

        def add_bias(b):
            biases.append(np.tile(np.asarray(b, np.float32), W))
            return len(biases) - 1

        prog = {
            "pre0": {"off": add_mat(_pack_conv1x1(self.pre0["w"],
                                                  self.pre0["scale"], W)),
                     "bias": add_bias(self.pre0["bias"])},
            "pre1": {"off": add_mat(_pack_conv1x1(self.pre1["w"],
                                                  self.pre1["scale"], W)),
                     "bias": add_bias(self.pre1["bias"])},
        }
        prog_ops = {}
        for to_i, ops in self._ops.items():
            prog_ops[to_i] = {}
            for from_i, op_list in ops.items():
                packed_list = []
                for name, params in op_list:
                    if name == "sep_conv_3x3":
                        pp = {}
                        for sk in ("s1", "s2"):
                            pp[sk] = {"off": add_mat(
                                          _pack_sepconv_stage(params[sk], W)),
                                      "bias": add_bias(params[sk]["bias"])}
                        packed_list.append((name, pp))
                    else:
                        packed_list.append((name, {}))
                prog_ops[to_i][from_i] = packed_list
        prog["ops"] = prog_ops
        packed = (prog, np.concatenate(cols, axis=1), np.stack(biases))
        self._packed[W] = packed
        return packed

    # ------------------------- lane-dense core path --------------------------
    def apply_lane_dense(self, s0_ld, s1_ld, block_batch=None):
        """s*_ld: (N, H, W*C) lane-dense.  Returns (N, H, n_cat*W*C)."""
        N, H, WC = s0_ld.shape
        C = self.C
        W = WC // C
        n_cat = self.multiplier
        assert WC % 128 == 0, "lane-dense fast path needs W*C % 128 == 0"
        prog, w_big, b_arr = self._get_packed(W)

        # Batch block: largest B <= 8 dividing N that keeps >= 2 grid steps
        # (so both v7x TensorCores get work); B is capped to bound vreg pressure.
        B = block_batch
        if B is None:
            B = 1
            for cand in range(min(8, N), 0, -1):
                if N % cand == 0 and (N // cand >= 2 or N == 1):
                    B = cand
                    break
        assert N % B == 0
        assert (B * H) % 8 == 0, "block sublane count must be a multiple of 8"

        s0f = s0_ld.reshape(N * H, WC)
        s1f = s1_ld.reshape(N * H, WC)

        out_flat = pl.pallas_call(
            _make_cell_kernel(prog, C, WC, H),
            out_shape=jax.ShapeDtypeStruct((N * H, n_cat * WC), jnp.float32),
            grid=(N // B,),
            in_specs=[
                pl.BlockSpec((B * H, WC), lambda n: (n, 0)),
                pl.BlockSpec((B * H, WC), lambda n: (n, 0)),
                # Constant index maps: weights/biases fetched once, not per step.
                # TODO(synk): single-buffer these (pl.Buffered(1)) if VMEM binds.
                pl.BlockSpec(w_big.shape, lambda n: (0, 0)),
                pl.BlockSpec(b_arr.shape, lambda n: (0, 0)),
            ],
            out_specs=pl.BlockSpec((B * H, n_cat * WC), lambda n: (n, 0)),
            compiler_params=pltpu.CompilerParams(
                dimension_semantics=("parallel",)),
        )(s0f, s1f, jnp.asarray(w_big), jnp.asarray(b_arr))
        return out_flat.reshape(N, H, n_cat * WC)

    # ----------------------------- NCHW interface ----------------------------
    def __call__(self, s0_nchw, s1_nchw, drop_prob=0.0):
        # TODO(synk): drop_path (training-mode stochastic depth) not implemented;
        # this reproduces the eval-mode forward (self.training == False).
        N, C0, H, W = s0_nchw.shape
        _, C1, H1, W1 = s1_nchw.shape
        assert (H, W) == (H1, W1) and C0 == C1 == self.C
        C, n_cat = self.C, self.multiplier

        s0_ld = nchw_to_lane_dense(s0_nchw)
        s1_ld = nchw_to_lane_dense(s1_nchw)
        out_ld = self.apply_lane_dense(s0_ld, s1_ld)

        # (N, H, n_cat*W*C) -> NCHW (N, n_cat*C, H, W); output channel = si*C + c,
        # matching torch.cat([state2, state3], dim=1).
        out = out_ld.reshape(N, H, n_cat, W, C)
        return jnp.transpose(out, (0, 2, 4, 1, 3)).reshape(N, n_cat * C, H, W)


# ---------------------------- pure-JAX reference -----------------------------

def _ref_relu_conv1x1_bn(x, p):
    N, H, W, Cin = x.shape
    y = jnp.maximum(x, 0.0).reshape(-1, Cin) @ p["w"]
    return (y * p["scale"] + p["bias"]).reshape(N, H, W, -1)


def _ref_sepconv_stage(x, p):
    N, H, W, C = x.shape
    xp = jnp.pad(jnp.maximum(x, 0.0), ((0, 0), (1, 1), (1, 1), (0, 0)))
    acc = jnp.zeros_like(x)
    for dy in range(3):
        for dx in range(3):
            acc = acc + xp[:, dy:dy + H, dx:dx + W, :] * p["dw"][dy, dx]
    y = acc.reshape(-1, C) @ p["pw"]
    return (y * p["scale"] + p["bias"]).reshape(N, H, W, C)


def _ref_maxpool(x):
    N, H, W, C = x.shape
    xp = jnp.pad(x, ((0, 0), (1, 1), (1, 1), (0, 0)), constant_values=-jnp.inf)
    out = x
    for dy in range(3):
        for dx in range(3):
            out = jnp.maximum(out, xp[:, dy:dy + H, dx:dx + W, :])
    return out


def _ref_cell(cell, s0_nchw, s1_nchw):
    s0 = jnp.transpose(s0_nchw, (0, 2, 3, 1))
    s1 = jnp.transpose(s1_nchw, (0, 2, 3, 1))
    s0 = _ref_relu_conv1x1_bn(s0, cell.pre0)
    s1 = _ref_relu_conv1x1_bn(s1, cell.pre1)
    states = {"0": s0, "1": s1}

    def apply_op(name, params, x):
        if name == "skip_connect":
            return x
        if name == "max_pool_3x3":
            return _ref_maxpool(x)
        return _ref_sepconv_stage(_ref_sepconv_stage(x, params["s1"]), params["s2"])

    for to_i, ops in cell._ops.items():
        h = []
        for from_i, op_list in ops.items():
            if from_i not in states:
                continue
            h.append(sum(apply_op(n, p, states[from_i]) for n, p in op_list))
        states[to_i] = sum(h)
    cat = jnp.concatenate(list(states.values())[2:], axis=-1)
    return jnp.transpose(cat, (0, 3, 1, 2))


# ----------------------------------- main ------------------------------------

if __name__ == "__main__":
    key = jax.random.PRNGKey(0)
    kcell, ks0, ks1 = jax.random.split(key, 3)

    N, H, W = 8, 16, 16
    C_prev_prev, C_prev, C = 8, 8, 8          # W * C = 128 -> lane-dense layout

    cell = DCOCellPallas(GENOTYPE, C_prev_prev, C_prev, C,
                         reduction=False, reduction_prev=False, key=kcell)

    s0 = jax.random.normal(ks0, (N, C_prev_prev, H, W), jnp.float32)
    s1 = jax.random.normal(ks1, (N, C_prev, H, W), jnp.float32)

    fwd = jax.jit(lambda a, b: cell(a, b))
    out = jax.block_until_ready(fwd(s0, s1))

    assert out.shape == (N, cell.multiplier * C, H, W), out.shape

    ref = jax.block_until_ready(_ref_cell(cell, s0, s1))
    err = float(jnp.max(jnp.abs(out - ref)))
    assert jnp.allclose(out, ref, atol=2e-3, rtol=2e-3), \
        f"mismatch vs reference, max|diff|={err}"

    print("KERNEL_OK")
</pallas_src>

<mosaic_0001>
module attributes {stable_mosaic.version = 11 : i64} {
  func.func @kernel(%arg0: i32, %arg1: memref<64x128xf32, #tpu.memory_space<vmem>>, %arg2: memref<64x128xf32, #tpu.memory_space<vmem>>, %arg3: memref<128x1792xf32, #tpu.memory_space<vmem>>, %arg4: memref<6x128xf32, #tpu.memory_space<vmem>>, %arg5: memref<64x256xf32, #tpu.memory_space<vmem>>) attributes {dimension_semantics = [#tpu.dimension_semantics<parallel>], iteration_bounds = array<i64: 2>, scalar_prefetch = 0 : i64, scratch_operands = 0 : i64, tpu.core_type = #tpu.core_type<tc>, window_params = [{transform_indices = @transform_0, window_bounds = array<i64: 64, 128>}, {transform_indices = @transform_1, window_bounds = array<i64: 64, 128>}, {pipeline_mode = #tpu.pipeline_mode<synchronous>, transform_indices = @transform_2, window_bounds = array<i64: 128, 1792>}, {pipeline_mode = #tpu.pipeline_mode<synchronous>, transform_indices = @transform_3, window_bounds = array<i64: 6, 128>}, {transform_indices = @transform_4, window_bounds = array<i64: 64, 256>}]} {
    %0 = tpu.iota {dimensions = array<i32: 0>} : vector<64x128xi32>
    %c16_i32 = arith.constant 16 : i32
    %c0_i32 = arith.constant 0 : i32
    %1 = arith.cmpi eq, %c16_i32, %c0_i32 : i32
    %c1_i32 = arith.constant 1 : i32
    %2 = arith.select %1, %c1_i32, %c16_i32 : i32
    %3 = vector.broadcast %2 : i32 to vector<64x128xi32>
    %4 = arith.remsi %0, %3 : vector<64x128xi32>
    %c0_i32_0 = arith.constant 0 : i32
    %5 = vector.broadcast %c0_i32_0 : i32 to vector<64x128xi32>
    %6 = arith.cmpi ne, %4, %5 : vector<64x128xi32>
    %c0_i32_1 = arith.constant 0 : i32
    %7 = vector.broadcast %c0_i32_1 : i32 to vector<64x128xi32>
    %8 = arith.cmpi slt, %4, %7 : vector<64x128xi32>
    %c0_i32_2 = arith.constant 0 : i32
    %9 = arith.cmpi slt, %2, %c0_i32_2 : i32
    %10 = vector.broadcast %9 : i1 to vector<64x128xi1>
    %11 = vector.broadcast %10 : vector<64x128xi1> to vector<64x128xi1>
    %12 = arith.xori %8, %11 : vector<64x128xi1>
    %13 = arith.andi %12, %6 : vector<64x128xi1>
    %14 = vector.broadcast %2 : i32 to vector<64x128xi32>
    %15 = arith.addi %4, %14 : vector<64x128xi32>
    %16 = arith.select %13, %15, %4 : vector<64x128xi1>, vector<64x128xi32>
    %c0_i32_3 = arith.constant 0 : i32
    %17 = vector.broadcast %c0_i32_3 : i32 to vector<64x128xi32>
    %18 = arith.cmpi eq, %16, %17 : vector<64x128xi32>
    %c15_i32 = arith.constant 15 : i32
    %19 = vector.broadcast %c15_i32 : i32 to vector<64x128xi32>
    %20 = arith.cmpi eq, %16, %19 : vector<64x128xi32>
    %21 = tpu.iota {dimensions = array<i32: 1>} : vector<64x128xi32>
    %c8_i32 = arith.constant 8 : i32
    %22 = vector.broadcast %c8_i32 : i32 to vector<64x128xi32>
    %23 = arith.cmpi slt, %21, %22 : vector<64x128xi32>
    %c120_i32 = arith.constant 120 : i32
    %24 = vector.broadcast %c120_i32 : i32 to vector<64x128xi32>
    %25 = arith.cmpi sge, %21, %24 : vector<64x128xi32>
    %c0 = arith.constant 0 : index
    %c0_4 = arith.constant 0 : index
    %26 = vector.load %arg1[%c0, %c0_4] : memref<64x128xf32, #tpu.memory_space<vmem>>, vector<64x128xf32>
    %cst = arith.constant 0.000000e+00 : f32
    %27 = vector.broadcast %cst : f32 to vector<64x128xf32>
    %28 = arith.maximumf %26, %27 : vector<64x128xf32>
    %c0_5 = arith.constant 0 : index
    %c0_6 = arith.constant 0 : index
    %29 = vector.load %arg3[%c0_5, %c0_6] : memref<128x1792xf32, #tpu.memory_space<vmem>>, vector<128x128xf32>
    %cst_7 = arith.constant dense<0.000000e+00> : vector<64x128xf32>
    %30 = tpu.matmul %28, %29, %cst_7 {dimension_numbers = #tpu.dot_dimension_numbers<[1], [0], [0], [1], [0, 0, 1, 1], [], []>} : vector<64x128xf32>, vector<128x128xf32>, vector<64x128xf32> -> vector<64x128xf32>
    %c0_8 = arith.constant 0 : index
    %c0_9 = arith.constant 0 : index
    %31 = vector.load %arg4[%c0_8, %c0_9] : memref<6x128xf32, #tpu.memory_space<vmem>>, vector<1x128xf32>
    %32 = vector.broadcast %31 : vector<1x128xf32> to vector<64x128xf32>
    %33 = arith.addf %30, %32 : vector<64x128xf32>
    %c0_10 = arith.constant 0 : index
    %c0_11 = arith.constant 0 : index
    %34 = vector.load %arg2[%c0_10, %c0_11] : memref<64x128xf32, #tpu.memory_space<vmem>>, vector<64x128xf32>
    %cst_12 = arith.constant 0.000000e+00 : f32
    %35 = vector.broadcast %cst_12 : f32 to vector<64x128xf32>
    %36 = arith.maximumf %34, %35 : vector<64x128xf32>
    %c0_13 = arith.constant 0 : index
    %c128 = arith.constant 128 : index
    %37 = vector.load %arg3[%c0_13, %c128] : memref<128x1792xf32, #tpu.memory_space<vmem>>, vector<128x128xf32>
    %cst_14 = arith.constant dense<0.000000e+00> : vector<64x128xf32>
    %38 = tpu.matmul %36, %37, %cst_14 {dimension_numbers = #tpu.dot_dimension_numbers<[1], [0], [0], [1], [0, 0, 1, 1], [], []>} : vector<64x128xf32>, vector<128x128xf32>, vector<64x128xf32> -> vector<64x128xf32>
    %c1 = arith.constant 1 : index
    %c0_15 = arith.constant 0 : index
    %39 = vector.load %arg4[%c1, %c0_15] : memref<6x128xf32, #tpu.memory_space<vmem>>, vector<1x128xf32>
    %40 = vector.broadcast %39 : vector<1x128xf32> to vector<64x128xf32>
    %41 = arith.addf %38, %40 : vector<64x128xf32>
    %cst_16 = arith.constant 0.000000e+00 : f32
    %42 = vector.broadcast %cst_16 : f32 to vector<64x128xf32>
    %43 = arith.maximumf %33, %42 : vector<64x128xf32>
    %c0_17 = arith.constant 0 : index
    %c256 = arith.constant 256 : index
    %44 = vector.load %arg3[%c0_17, %c256] : memref<128x1792xf32, #tpu.memory_space<vmem>>, vector<128x384xf32>
    %cst_18 = arith.constant dense<0.000000e+00> : vector<64x384xf32>
    %45 = tpu.matmul %43, %44, %cst_18 {dimension_numbers = #tpu.dot_dimension_numbers<[1], [0], [0], [1], [0, 0, 1, 1], [], []>} : vector<64x128xf32>, vector<128x384xf32>, vector<64x384xf32> -> vector<64x384xf32>
    %46 = vector.extract_strided_slice %45 {offsets = [0, 0], sizes = [64, 128], strides = [1, 1]} : vector<64x384xf32> to vector<64x128xf32>
    %47 = vector.extract_strided_slice %45 {offsets = [0, 128], sizes = [64, 128], strides = [1, 1]} : vector<64x384xf32> to vector<64x128xf32>
    %48 = vector.extract_strided_slice %45 {offsets = [0, 256], sizes = [64, 128], strides = [1, 1]} : vector<64x384xf32> to vector<64x128xf32>
    %c1_i32_19 = arith.constant 1 : i32
    %49 = tpu.dynamic_rotate %46 by %c1_i32_19 dim 0 : vector<64x128xf32>, i32 -> vector<64x128xf32>
    %cst_20 = arith.constant 0.000000e+00 : f32
    %50 = vector.broadcast %cst_20 : f32 to vector<64x128xf32>
    %51 = arith.select %18, %50, %49 : vector<64x128xi1>, vector<64x128xf32>
    %52 = arith.addf %51, %47 : vector<64x128xf32>
    %c63_i32 = arith.constant 63 : i32
    %53 = tpu.dynamic_rotate %48 by %c63_i32 dim 0 : vector<64x128xf32>, i32 -> vector<64x128xf32>
    %cst_21 = arith.constant 0.000000e+00 : f32
    %54 = vector.broadcast %cst_21 : f32 to vector<64x128xf32>
    %55 = arith.select %20, %54, %53 : vector<64x128xi1>, vector<64x128xf32>
    %56 = arith.addf %52, %55 : vector<64x128xf32>
    %c2 = arith.constant 2 : index
    %c0_22 = arith.constant 0 : index
    %57 = vector.load %arg4[%c2, %c0_22] : memref<6x128xf32, #tpu.memory_space<vmem>>, vector<1x128xf32>
    %58 = vector.broadcast %57 : vector<1x128xf32> to vector<64x128xf32>
    %59 = arith.addf %56, %58 : vector<64x128xf32>
    %cst_23 = arith.constant 0.000000e+00 : f32
    %60 = vector.broadcast %cst_23 : f32 to vector<64x128xf32>
    %61 = arith.maximumf %59, %60 : vector<64x128xf32>
    %c0_24 = arith.constant 0 : index
    %c640 = arith.constant 640 : index
    %62 = vector.load %arg3[%c0_24, %c640] : memref<128x1792xf32, #tpu.memory_space<vmem>>, vector<128x384xf32>
    %cst_25 = arith.constant dense<0.000000e+00> : vector<64x384xf32>
    %63 = tpu.matmul %61, %62, %cst_25 {dimension_numbers = #tpu.dot_dimension_numbers<[1], [0], [0], [1], [0, 0, 1, 1], [], []>} : vector<64x128xf32>, vector<128x384xf32>, vector<64x384xf32> -> vector<64x384xf32>
    %64 = vector.extract_strided_slice %63 {offsets = [0, 0], sizes = [64, 128], strides = [1, 1]} : vector<64x384xf32> to vector<64x128xf32>
    %65 = vector.extract_strided_slice %63 {offsets = [0, 128], sizes = [64, 128], strides = [1, 1]} : vector<64x384xf32> to vector<64x128xf32>
    %66 = vector.extract_strided_slice %63 {offsets = [0, 256], sizes = [64, 128], strides = [1, 1]} : vector<64x384xf32> to vector<64x128xf32>
    %c1_i32_26 = arith.constant 1 : i32
    %67 = tpu.dynamic_rotate %64 by %c1_i32_26 dim 0 : vector<64x128xf32>, i32 -> vector<64x128xf32>
    %cst_27 = arith.constant 0.000000e+00 : f32
    %68 = vector.broadcast %cst_27 : f32 to vector<64x128xf32>
    %69 = arith.select %18, %68, %67 : vector<64x128xi1>, vector<64x128xf32>
    %70 = arith.addf %69, %65 : vector<64x128xf32>
    %c63_i32_28 = arith.constant 63 : i32
    %71 = tpu.dynamic_rotate %66 by %c63_i32_28 dim 0 : vector<64x128xf32>, i32 -> vector<64x128xf32>
    %cst_29 = arith.constant 0.000000e+00 : f32
    %72 = vector.broadcast %cst_29 : f32 to vector<64x128xf32>
    %73 = arith.select %20, %72, %71 : vector<64x128xi1>, vector<64x128xf32>
    %74 = arith.addf %70, %73 : vector<64x128xf32>
    %c3 = arith.constant 3 : index
    %c0_30 = arith.constant 0 : index
    %75 = vector.load %arg4[%c3, %c0_30] : memref<6x128xf32, #tpu.memory_space<vmem>>, vector<1x128xf32>
    %76 = vector.broadcast %75 : vector<1x128xf32> to vector<64x128xf32>
    %77 = arith.addf %74, %76 : vector<64x128xf32>
    %78 = arith.addf %77, %41 : vector<64x128xf32>
    %c120_i32_31 = arith.constant 120 : i32
    %79 = tpu.dynamic_rotate %41 by %c120_i32_31 dim 1 : vector<64x128xf32>, i32 -> vector<64x128xf32>
    %cst_32 = arith.constant 0xFF800000 : f32
    %80 = vector.broadcast %cst_32 : f32 to vector<64x128xf32>
    %81 = arith.select %25, %80, %79 : vector<64x128xi1>, vector<64x128xf32>
    %c8_i32_33 = arith.constant 8 : i32
    %82 = tpu.dynamic_rotate %41 by %c8_i32_33 dim 1 : vector<64x128xf32>, i32 -> vector<64x128xf32>
    %cst_34 = arith.constant 0xFF800000 : f32
    %83 = vector.broadcast %cst_34 : f32 to vector<64x128xf32>
    %84 = arith.select %23, %83, %82 : vector<64x128xi1>, vector<64x128xf32>
    %85 = arith.maximumf %84, %81 : vector<64x128xf32>
    %86 = arith.maximumf %41, %85 : vector<64x128xf32>
    %c63_i32_35 = arith.constant 63 : i32
    %87 = tpu.dynamic_rotate %86 by %c63_i32_35 dim 0 : vector<64x128xf32>, i32 -> vector<64x128xf32>
    %cst_36 = arith.constant 0xFF800000 : f32
    %88 = vector.broadcast %cst_36 : f32 to vector<64x128xf32>
    %89 = arith.select %20, %88, %87 : vector<64x128xi1>, vector<64x128xf32>
    %c1_i32_37 = arith.constant 1 : i32
    %90 = tpu.dynamic_rotate %86 by %c1_i32_37 dim 0 : vector<64x128xf32>, i32 -> vector<64x128xf32>
    %cst_38 = arith.constant 0xFF800000 : f32
    %91 = vector.broadcast %cst_38 : f32 to vector<64x128xf32>
    %92 = arith.select %18, %91, %90 : vector<64x128xi1>, vector<64x128xf32>
    %93 = arith.maximumf %92, %89 : vector<64x128xf32>
    %94 = arith.maximumf %86, %93 : vector<64x128xf32>
    %cst_39 = arith.constant 0.000000e+00 : f32
    %95 = vector.broadcast %cst_39 : f32 to vector<64x128xf32>
    %96 = arith.maximumf %78, %95 : vector<64x128xf32>
    %c0_40 = arith.constant 0 : index
    %c1024 = arith.constant 1024 : index
    %97 = vector.load %arg3[%c0_40, %c1024] : memref<128x1792xf32, #tpu.memory_space<vmem>>, vector<128x384xf32>
    %cst_41 = arith.constant dense<0.000000e+00> : vector<64x384xf32>
    %98 = tpu.matmul %96, %97, %cst_41 {dimension_numbers = #tpu.dot_dimension_numbers<[1], [0], [0], [1], [0, 0, 1, 1], [], []>} : vector<64x128xf32>, vector<128x384xf32>, vector<64x384xf32> -> vector<64x384xf32>
    %99 = vector.extract_strided_slice %98 {offsets = [0, 0], sizes = [64, 128], strides = [1, 1]} : vector<64x384xf32> to vector<64x128xf32>
    %100 = vector.extract_strided_slice %98 {offsets = [0, 128], sizes = [64, 128], strides = [1, 1]} : vector<64x384xf32> to vector<64x128xf32>
    %101 = vector.extract_strided_slice %98 {offsets = [0, 256], sizes = [64, 128], strides = [1, 1]} : vector<64x384xf32> to vector<64x128xf32>
    %c1_i32_42 = arith.constant 1 : i32
    %102 = tpu.dynamic_rotate %99 by %c1_i32_42 dim 0 : vector<64x128xf32>, i32 -> vector<64x128xf32>
    %cst_43 = arith.constant 0.000000e+00 : f32
    %103 = vector.broadcast %cst_43 : f32 to vector<64x128xf32>
    %104 = arith.select %18, %103, %102 : vector<64x128xi1>, vector<64x128xf32>
    %105 = arith.addf %104, %100 : vector<64x128xf32>
    %c63_i32_44 = arith.constant 63 : i32
    %106 = tpu.dynamic_rotate %101 by %c63_i32_44 dim 0 : vector<64x128xf32>, i32 -> vector<64x128xf32>
    %cst_45 = arith.constant 0.000000e+00 : f32
    %107 = vector.broadcast %cst_45 : f32 to vector<64x128xf32>
    %108 = arith.select %20, %107, %106 : vector<64x128xi1>, vector<64x128xf32>
    %109 = arith.addf %105, %108 : vector<64x128xf32>
    %c4 = arith.constant 4 : index
    %c0_46 = arith.constant 0 : index
    %110 = vector.load %arg4[%c4, %c0_46] : memref<6x128xf32, #tpu.memory_space<vmem>>, vector<1x128xf32>
    %111 = vector.broadcast %110 : vector<1x128xf32> to vector<64x128xf32>
    %112 = arith.addf %109, %111 : vector<64x128xf32>
    %cst_47 = arith.constant 0.000000e+00 : f32
    %113 = vector.broadcast %cst_47 : f32 to vector<64x128xf32>
    %114 = arith.maximumf %112, %113 : vector<64x128xf32>
    %c0_48 = arith.constant 0 : index
    %c1408 = arith.constant 1408 : index
    %115 = vector.load %arg3[%c0_48, %c1408] : memref<128x1792xf32, #tpu.memory_space<vmem>>, vector<128x384xf32>
    %cst_49 = arith.constant dense<0.000000e+00> : vector<64x384xf32>
    %116 = tpu.matmul %114, %115, %cst_49 {dimension_numbers = #tpu.dot_dimension_numbers<[1], [0], [0], [1], [0, 0, 1, 1], [], []>} : vector<64x128xf32>, vector<128x384xf32>, vector<64x384xf32> -> vector<64x384xf32>
    %117 = vector.extract_strided_slice %116 {offsets = [0, 0], sizes = [64, 128], strides = [1, 1]} : vector<64x384xf32> to vector<64x128xf32>
    %118 = vector.extract_strided_slice %116 {offsets = [0, 128], sizes = [64, 128], strides = [1, 1]} : vector<64x384xf32> to vector<64x128xf32>
    %119 = vector.extract_strided_slice %116 {offsets = [0, 256], sizes = [64, 128], strides = [1, 1]} : vector<64x384xf32> to vector<64x128xf32>
    %c1_i32_50 = arith.constant 1 : i32
    %120 = tpu.dynamic_rotate %117 by %c1_i32_50 dim 0 : vector<64x128xf32>, i32 -> vector<64x128xf32>
    %cst_51 = arith.constant 0.000000e+00 : f32
    %121 = vector.broadcast %cst_51 : f32 to vector<64x128xf32>
    %122 = arith.select %18, %121, %120 : vector<64x128xi1>, vector<64x128xf32>
    %123 = arith.addf %122, %118 : vector<64x128xf32>
    %c63_i32_52 = arith.constant 63 : i32
    %124 = tpu.dynamic_rotate %119 by %c63_i32_52 dim 0 : vector<64x128xf32>, i32 -> vector<64x128xf32>
    %cst_53 = arith.constant 0.000000e+00 : f32
    %125 = vector.broadcast %cst_53 : f32 to vector<64x128xf32>
    %126 = arith.select %20, %125, %124 : vector<64x128xi1>, vector<64x128xf32>
    %127 = arith.addf %123, %126 : vector<64x128xf32>
    %c5 = arith.constant 5 : index
    %c0_54 = arith.constant 0 : index
    %128 = vector.load %arg4[%c5, %c0_54] : memref<6x128xf32, #tpu.memory_space<vmem>>, vector<1x128xf32>
    %129 = vector.broadcast %128 : vector<1x128xf32> to vector<64x128xf32>
    %130 = arith.addf %127, %129 : vector<64x128xf32>
    %131 = arith.addf %94, %130 : vector<64x128xf32>
    %c0_55 = arith.constant 0 : index
    %c0_56 = arith.constant 0 : index
    %132 = vector.load %arg5[%c0_55, %c0_56] : memref<64x256xf32, #tpu.memory_space<vmem>>, vector<64x128xf32>
    tpu.vector_store %arg5[%c0_55, %c0_56], %78 {strides = array<i32>} : memref<64x256xf32, #tpu.memory_space<vmem>>, vector<64x128xf32>,
    %c0_57 = arith.constant 0 : index
    %c128_58 = arith.constant 128 : index
    %133 = vector.load %arg5[%c0_57, %c128_58] : memref<64x256xf32, #tpu.memory_space<vmem>>, vector<64x128xf32>
    tpu.vector_store %arg5[%c0_57, %c128_58], %131 {strides = array<i32>} : memref<64x256xf32, #tpu.memory_space<vmem>>, vector<64x128xf32>,
    return
  }
  func.func @transform_0(%arg0: i32) -> (i32, i32) {
    %c0_i32 = arith.constant 0 : i32
    %c0_i32_0 = arith.constant 0 : i32
    return %arg0, %c0_i32 : i32, i32
  }
  func.func @transform_1(%arg0: i32) -> (i32, i32) {
    %c0_i32 = arith.constant 0 : i32
    %c0_i32_0 = arith.constant 0 : i32
    return %arg0, %c0_i32 : i32, i32
  }
  func.func @transform_2(%arg0: i32) -> (i32, i32) {
    %c0_i32 = arith.constant 0 : i32
    %c0_i32_0 = arith.constant 0 : i32
    %c0_i32_1 = arith.constant 0 : i32
    return %c0_i32, %c0_i32_0 : i32, i32
  }
  func.func @transform_3(%arg0: i32) -> (i32, i32) {
    %c0_i32 = arith.constant 0 : i32
    %c0_i32_0 = arith.constant 0 : i32
    %c0_i32_1 = arith.constant 0 : i32
    return %c0_i32, %c0_i32_0 : i32, i32
  }
  func.func @transform_4(%arg0: i32) -> (i32, i32) {
    %c0_i32 = arith.constant 0 : i32
    %c0_i32_0 = arith.constant 0 : i32
    return %arg0, %c0_i32 : i32, i32
  }
}

</mosaic_0001>

<bundles_post_ra>
// kernel: _lambda_.1
= control target key start
LH: loop header
LB: loop body
LE: loop exit
PB: predicated region body
PF: predicated region fallthrough
CT: control target
= control target key end

     0   :  { %s3066_s15 = smov 0   ;;  %s4399_s0 = inlined_call_operand.vmem [shape: f32[128,128], index: 0, kind: input, shape index: {}]   ;;  %s4400_s1 = inlined_call_operand.vmem [shape: f32[128,128], index: 1, kind: input, shape index: {}]   ;;  %s4401_s2 = inlined_call_operand.vmem [shape: f32[128,1792], index: 2, kind: input, shape index: {}]   ;;  %s4402_s3 = inlined_call_operand.vmem [shape: f32[6,128], index: 3, kind: input, shape index: {}]   ;;  %s4403_s4 = inlined_call_operand.vmem [shape: f32[128,256], index: 4, kind: output, shape index: {}]  }
   0x1 LB: > { %s2270_s16 = sadd.s32 4294967295, %s3036_s15   ;;  %p2274_p0 = scmp.ge.s32.totalorder %s3036_s15, 1  ;;  %s3036_s15 = sphi %s3066_s15, %s14_s15  }
   0x2   : > { %p174_p1 = scmp.lt.s32.totalorder %s3036_s15, 3 }
   0x4   : > { %p175_p2 = pnand %p2274_p0, %p174_p1 }
   0x5   : > { %v366_v0 = vld [vmem:[%s4401_s2] sm:$0xff] (!%p175_p2)  ;;  %v367_v1 = vld [vmem:[%s4401_s2 + $0x70] sm:$0xff] (!%p175_p2)  ;;  %s2275_s23 = sshll.u32 (!%p175_p2), %s2270_s16, 3  ;;  %v508_v10 = vld [vmem:[%s4401_s2 + $0x8] sm:$0xff] (!%p175_p2)  ;;  %s3039_s27 = smov (!%p175_p2), 8  }
   0x6   : > { %178 = sbr.rel (%p175_p2) target bundleno = 1268 (0x4f4), region = 36  ;;  %v368_v2 = vld [vmem:[%s4401_s2 + $0xe0] sm:$0xff] (!%p175_p2)  ;;  %v2699_v3 = vpack.c.bf16 (!%p175_p2), %v367_v1, %v366_v0  ;;  %v369_v4 = vld [vmem:[%s4401_s2 + $0x150] sm:$0xff] (!%p175_p2)  ;;  %p207_p3 = scmp.lt.s32.totalorder (!%p175_p2), %s2275_s23, 15  ;;  %v509_v11 = vld [vmem:[%s4401_s2 + $0x78] sm:$0xff] (!%p175_p2) }
   0x7   : > { %v2703_v5 = vpack.c.bf16 (!%p175_p2), %v369_v4, %v368_v2  ;;  %v370_v6 = vld [vmem:[%s4401_s2 + $0x1c0] sm:$0xff] (!%p175_p2)  ;;  %v371_v7 = vld [vmem:[%s4401_s2 + $0x230] sm:$0xff] (!%p175_p2)  ;;  %v2731_v13 = vpack.c.bf16 (!%p175_p2), %v509_v11, %v508_v10  ;;  %v510_v14 = vld [vmem:[%s4401_s2 + $0xe8] sm:$0xff] (!%p175_p2)  ;;  %s3040_s28 = smov (!%p175_p2), 120  }
   0x8   : > { %2700 = vmatprep.subr.bf16.mxu0 (!%p175_p2), %v2699_v3  ;;  %v2707_v8 = vpack.c.bf16 (!%p175_p2), %v371_v7, %v370_v6  ;;  %v372_v9 = vld [vmem:[%s4401_s2 + $0x2a0] sm:$0xff] (!%p175_p2)  ;;  %v373_v12 = vld [vmem:[%s4401_s2 + $0x310] sm:$0xff] (!%p175_p2)  ;;  %v511_v15 = vld [vmem:[%s4401_s2 + $0x158] sm:$0xff] (!%p175_p2) }
   0x9   : > { %2702 = vmatpush3.bf16.msra.mxu0 (!%p175_p2), %v2699_v3  ;;  %v2735_v17 = vpack.c.bf16 (!%p175_p2), %v511_v15, %v510_v14  ;;  %v512_v18 = vld [vmem:[%s4401_s2 + $0x1c8] sm:$0xff] (!%p175_p2)  ;;  %2732 = vmatprep.subr.bf16.mxu1 (!%p175_p2), %v2731_v13  ;;  %v2711_v20 = vpack.c.bf16 (!%p175_p2), %v373_v12, %v372_v9  ;;  %v513_v21 = vld [vmem:[%s4401_s2 + $0x238] sm:$0xff] (!%p175_p2)  ;;  %v374_v22 = vld [vmem:[%s4401_s2 + $0x380] sm:$0xff] (!%p175_p2) }
   0xa   : > { %2704 = vmatprep.subr.bf16.mxu0 (!%p175_p2), %v2703_v5  ;;  %2734 = vmatpush3.bf16.msra.mxu1 (!%p175_p2), %v2731_v13  ;;  %v375_v23 = vld [vmem:[%s4401_s2 + $0x3f0] sm:$0xff] (!%p175_p2)  ;;  %v2739_v24 = vpack.c.bf16 (!%p175_p2), %v513_v21, %v512_v18  ;;  %v514_v25 = vld [vmem:[%s4401_s2 + $0x2a8] sm:$0xff] (!%p175_p2)  ;;  %v515_v26 = vld [vmem:[%s4401_s2 + $0x318] sm:$0xff] (!%p175_p2) }
   0xb   : > { %2736 = vmatprep.subr.bf16.mxu1 (!%p175_p2), %v2735_v17  ;;  %v2715_v27 = vpack.c.bf16 (!%p175_p2), %v375_v23, %v374_v22  ;;  %v376_v29 = vld [vmem:[%s4401_s2 + $0x460] sm:$0xff] (!%p175_p2)  ;;  %v377_v30 = vld [vmem:[%s4401_s2 + $0x4d0] sm:$0xff] (!%p175_p2)  ;;  %v2743_v31 = vpack.c.bf16 (!%p175_p2), %v515_v26, %v514_v25  ;;  %v516_v33 = vld [vmem:[%s4401_s2 + $0x388] sm:$0xff] (!%p175_p2) }
   0xc   : > { %v517_v34 = vld [vmem:[%s4401_s2 + $0x3f8] sm:$0xff] (!%p175_p2)  ;;  %v2719_v35 = vpack.c.bf16 (!%p175_p2), %v377_v30, %v376_v29  ;;  %v378_v36 = vld [vmem:[%s4401_s2 + $0x540] sm:$0xff] (!%p175_p2)  ;;  %v379_v37 = vld [vmem:[%s4401_s2 + $0x5b0] sm:$0xff] (!%p175_p2) }
   0xd   : > { %s4421_s23 = smov (!%p207_p3, %s2275_s23), 15  ;;  %2706 = vmatpush3.bf16.msra.mxu0 %v2703_v5  ;;  %v2747_v38 = vpack.c.bf16 %v517_v34, %v516_v33  ;;  %v518_v39 = vld [vmem:[%s4401_s2 + $0x468] sm:$0xff]  ;;  %v519_v40 = vld [vmem:[%s4401_s2 + $0x4d8] sm:$0xff]  ;;  %v2723_v41 = vpack.c.bf16 %v379_v37, %v378_v36  ;;  %v380_v42 = vld [vmem:[%s4401_s2 + $0x620] sm:$0xff] }
   0xe   : > { %s2276_s6 = sshll.u32 %s4421_s23, 3  ;;  %2708 = vmatprep.subr.bf16.mxu0 %v2707_v8  ;;  %2738 = vmatpush3.bf16.msra.mxu1 %v2735_v17  ;;  %v381_v43 = vld [vmem:[%s4401_s2 + $0x690] sm:$0xff]  ;;  %v2751_v44 = vpack.c.bf16 %v519_v40, %v518_v39  ;;  %v520_v45 = vld [vmem:[%s4401_s2 + $0x548] sm:$0xff]  ;;  %v521_v46 = vld [vmem:[%s4401_s2 + $0x5b8] sm:$0xff] }
   0xf   : > { %s3110_s16 = scalar_lea.vmem %s4399_s0, %s2276_s6  ;;  %s3134_s7 = scalar_lea.vmem %s4400_s1, %s2276_s6  ;;  %2740 = vmatprep.subr.bf16.mxu1 %v2739_v24  ;;  %v2727_v47 = vpack.c.bf16 %v381_v43, %v380_v42  ;;  %v2755_v48 = vpack.c.bf16 %v521_v46, %v520_v45  ;;  %v643_v49 = vld [vmem:[%s4401_s2 + $0x18] sm:$0xff]  ;;  %v646_v50 = vld [vmem:[%s4401_s2 + $0x88] sm:$0xff]  ;;  %v642_v56 = vld [vmem:[%s4401_s2 + $0x10] sm:$0xff] }
  0x10   : > { %v350_v16 = vld [vmem:[%s3110_s16] sm:$0xff]  ;;  %v522_v51 = vld [vmem:[%s4401_s2 + $0x628] sm:$0xff]  ;;  %v523_v52 = vld [vmem:[%s4401_s2 + $0x698] sm:$0xff]  ;;  %v2763_v55 = vpack.c.bf16 %v646_v50, %v643_v49 }
  0x11   : > { %v358_v19 = vmax.f32 %v350_v16, 0.0  ;;  %2710 = vmatpush3.bf16.msra.mxu0 %v2707_v8  ;;  %v492_v28 = vld [vmem:[%s3134_s7] sm:$0xff]  ;;  %v351_v53 = vld [vmem:[%s3110_s16 + $0x8] sm:$0xff]  ;;  %v352_v54 = vld [vmem:[%s3110_s16 + $0x10] sm:$0xff]  ;;  %v2759_v58 = vpack.c.bf16 %v523_v52, %v522_v51 }
  0x12   : > { %2712 = vmatprep.subr.bf16.mxu0 %v2711_v20  ;;  %v500_v32 = vmax.f32 %v492_v28, 0.0  ;;  %2742 = vmatpush3.bf16.msra.mxu1 %v2739_v24  ;;  %v645_v57 = vld [vmem:[%s4401_s2 + $0x80] sm:$0xff]  ;;  %v649_v59 = vld [vmem:[%s4401_s2 + $0xf8] sm:$0xff]  ;;  %v652_v60 = vld [vmem:[%s4401_s2 + $0x168] sm:$0xff]  ;;  %v359_v61 = vmax.f32 %v351_v53, 0.0  ;;  %v360_v0 = vmax.f32 %v352_v54, 0.0 }
  0x13   : > { %2467 = vmatprep.mubr.f32.mxu0 %v358_v19  ;;  %2744 = vmatprep.subr.bf16.mxu1 %v2743_v31  ;;  %v644_v62 = vld [vmem:[%s4401_s2 + $0x20] sm:$0xff]  ;;  %v647_v63 = vld [vmem:[%s4401_s2 + $0x90] sm:$0xff]  ;;  %v353_v1 = vld [vmem:[%s3110_s16 + $0x18] sm:$0xff]  ;;  %v2765_v2 = vpack.c.bf16 %v645_v57, %v642_v56  ;;  %v2767_v5 = vpack.c.bf16 %v652_v60, %v649_v59 }
  0x14   : > { %2511 = vmatprep.mubr.f32.mxu1 %v500_v32  ;;  %v354_v3 = vld [vmem:[%s3110_s16 + $0x20] sm:$0xff]  ;;  %v493_v4 = vld [vmem:[%s3134_s7 + $0x8] sm:$0xff]  ;;  %v494_v6 = vld [vmem:[%s3134_s7 + $0x10] sm:$0xff]  ;;  %v2795_v7 = vpack.c.bf16 %v647_v63, %v644_v62  ;;  %v361_v9 = vmax.f32 %v353_v1, 0.0 }
  0x15   : > { %2714 = vmatpush3.bf16.msra.mxu0 %v2711_v20  ;;  %v648_v8 = vld [vmem:[%s4401_s2 + $0xf0] sm:$0xff]  ;;  %v651_v10 = vld [vmem:[%s4401_s2 + $0x160] sm:$0xff]  ;;  %v362_v13 = vmax.f32 %v354_v3, 0.0  ;;  %v355_v14 = vld [vmem:[%s3110_s16 + $0x28] sm:$0xff]  ;;  %v501_v15 = vmax.f32 %v493_v4, 0.0  ;;  %v502_v19 = vmax.f32 %v494_v6, 0.0 }
  0x16   : > { %2716 = vmatprep.subr.bf16.mxu0 %v2715_v27  ;;  %2746 = vmatpush3.bf16.msra.mxu1 %v2743_v31  ;;  %v650_v11 = vld [vmem:[%s4401_s2 + $0x100] sm:$0xff]  ;;  %v653_v12 = vld [vmem:[%s4401_s2 + $0x170] sm:$0xff]  ;;  %v655_v16 = vld [vmem:[%s4401_s2 + $0x1d8] sm:$0xff]  ;;  %v2769_v22 = vpack.c.bf16 %v651_v10, %v648_v8  ;;  %v363_v25 = vmax.f32 %v355_v14, 0.0 }
  0x17   : > { %2748 = vmatprep.subr.bf16.mxu1 %v2747_v38  ;;  %v658_v17 = vld [vmem:[%s4401_s2 + $0x248] sm:$0xff]  ;;  %v356_v18 = vld [vmem:[%s3110_s16 + $0x30] sm:$0xff]  ;;  %v495_v20 = vld [vmem:[%s3134_s7 + $0x18] sm:$0xff]  ;;  %v2799_v23 = vpack.c.bf16 %v653_v12, %v650_v11 }
  0x18   : > { %v496_v21 = vld [vmem:[%s3134_s7 + $0x20] sm:$0xff]  ;;  %v654_v24 = vld [vmem:[%s4401_s2 + $0x1d0] sm:$0xff]  ;;  %v2771_v26 = vpack.c.bf16 %v658_v17, %v655_v16  ;;  %v364_v30 = vmax.f32 %v356_v18, 0.0  ;;  %v357_v31 = vld [vmem:[%s3110_s16 + $0x38] sm:$0xff]  ;;  %v503_v32 = vmax.f32 %v495_v20, 0.0 }
  0x19   : > { %2718 = vmatpush3.bf16.msra.mxu0 %v2715_v27  ;;  %v657_v27 = vld [vmem:[%s4401_s2 + $0x240] sm:$0xff]  ;;  %v659_v29 = vld [vmem:[%s4401_s2 + $0x250] sm:$0xff]  ;;  %v661_v33 = vld [vmem:[%s4401_s2 + $0x2b8] sm:$0xff] }
  0x1a   : > { %2720 = vmatprep.subr.bf16.mxu0 %v2719_v35  ;;  %2750 = vmatpush3.bf16.msra.mxu1 %v2747_v38  ;;  %v656_v28 = vld [vmem:[%s4401_s2 + $0x1e0] sm:$0xff]  ;;  %v664_v34 = vld [vmem:[%s4401_s2 + $0x328] sm:$0xff]  ;;  %v498_v37 = vld [vmem:[%s3134_s7 + $0x30] sm:$0xff]  ;;  %v2773_v38 = vpack.c.bf16 %v657_v27, %v654_v24  ;;  %v3038_v24 = vmov 0.0  }
  0x1b   : > { %2752 = vmatprep.subr.bf16.mxu1 %v2751_v44  ;;  %v497_v36 = vld [vmem:[%s3134_s7 + $0x28] sm:$0xff]  ;;  %v2803_v39 = vpack.c.bf16 %v659_v29, %v656_v28  ;;  %v660_v40 = vld [vmem:[%s4401_s2 + $0x2b0] sm:$0xff]  ;;  %v2775_v42 = vpack.c.bf16 %v664_v34, %v661_v33  ;;  %v663_v43 = vld [vmem:[%s4401_s2 + $0x320] sm:$0xff]  ;;  %v506_v49 = vmax.f32 %v498_v37, 0.0 }
  0x1c   : > { %v665_v45 = vld [vmem:[%s4401_s2 + $0x330] sm:$0xff]  ;;  %v505_v46 = vmax.f32 %v497_v36, 0.0  ;;  %v499_v50 = vld [vmem:[%s3134_s7 + $0x38] sm:$0xff]  ;;  %v2777_v51 = vpack.c.bf16 %v663_v43, %v660_v40  ;;  %v668_v56 = vld [vmem:[%s4401_s2 + $0x3a0] sm:$0xff]  ;;  %s2290_s7 = sshll.u32 %s4421_s23, 4 }
  0x1d   : > { %2722 = vmatpush3.bf16.msra.mxu0 %v2719_v35  ;;  %v504_v35 = vmax.f32 %v496_v21, 0.0  ;;  %v666_v53 = vld [vmem:[%s4401_s2 + $0x390] sm:$0xff]  ;;  %v673_v59 = vld [vmem:[%s4401_s2 + $0x478] sm:$0xff]  ;;  %v676_v60 = vld [vmem:[%s4401_s2 + $0x4e8] sm:$0xff]  ;;  %s3859_s10 = scalar_lea.vmem %s4403_s4, %s2290_s7 }
  0x1e   : > { %2724 = vmatprep.subr.bf16.mxu0 %v2723_v41  ;;  %2754 = vmatpush3.bf16.msra.mxu1 %v2751_v44  ;;  %v662_v44 = vld [vmem:[%s4401_s2 + $0x2c0] sm:$0xff]  ;;  %v671_v57 = vld [vmem:[%s4401_s2 + $0x410] sm:$0xff]  ;;  %v679_v4 = vld [vmem:[%s4401_s2 + $0x558] sm:$0xff] }
  0x1f   : > { %2756 = vmatprep.subr.bf16.mxu1 %v2755_v48  ;;  %v2807_v52 = vpack.c.bf16 %v665_v45, %v662_v44  ;;  %v2811_v62 = vpack.c.bf16 %v671_v57, %v668_v56  ;;  %v672_v63 = vld [vmem:[%s4401_s2 + $0x470] sm:$0xff]  ;;  %v675_v1 = vld [vmem:[%s4401_s2 + $0x4e0] sm:$0xff]  ;;  %v688_v16 = vld [vmem:[%s4401_s2 + $0x6a8] sm:$0xff] }
  0x20   : > { %v677_v3 = vld [vmem:[%s4401_s2 + $0x4f0] sm:$0xff]  ;;  %v2785_v6 = vpack.c.bf16 %v675_v1, %v672_v63  ;;  %v681_v10 = vld [vmem:[%s4401_s2 + $0x5c0] sm:$0xff] }
  0x21   : > { %2726 = vmatpush3.bf16.msra.mxu0 %v2723_v41  ;;  %v365_v41 = vmax.f32 %v357_v31, 0.0  ;;  %v678_v8 = vld [vmem:[%s4401_s2 + $0x550] sm:$0xff]  ;;  %v680_v11 = vld [vmem:[%s4401_s2 + $0x560] sm:$0xff] }
  0x22   : > { %2728 = vmatprep.subr.bf16.mxu0 %v2727_v47  ;;  %2758 = vmatpush3.bf16.msra.mxu1 %v2755_v48  ;;  %v670_v48 = vld [vmem:[%s4401_s2 + $0x408] sm:$0xff]  ;;  %v683_v12 = vld [vmem:[%s4401_s2 + $0x5d0] sm:$0xff]  ;;  %v686_v21 = vld [vmem:[%s4401_s2 + $0x640] sm:$0xff] }
  0x23   : > { %2760 = vmatprep.subr.bf16.mxu1 %v2759_v58  ;;  %v2819_v14 = vpack.c.bf16 %v683_v12, %v680_v11  ;;  %v684_v18 = vld [vmem:[%s4401_s2 + $0x630] sm:$0xff] }
  0x24   : > { %v1002_v12 = vld [vmem:[%s4401_s2 + $0x110] sm:$0xff] }
  0x25   : > { %2730 = vmatpush3.bf16.msra.mxu0 %v2727_v47  ;;  %v667_v47 = vld [vmem:[%s4401_s2 + $0x398] sm:$0xff] }
  0x26   : > { %2764 = vmatprep.subr.bf16.mxu0 %v2763_v55  ;;  %2762 = vmatpush3.bf16.msra.mxu1 %v2759_v58  ;;  %v2779_v54 = vpack.c.bf16 %v670_v48, %v667_v47  ;;  %v669_v55 = vld [vmem:[%s4401_s2 + $0x400] sm:$0xff]  ;;  %v507_v58 = vmax.f32 %v499_v50, 0.0 }
  0x27   : > { %2796 = vmatprep.subr.bf16.mxu1 %v2795_v7 }
  0x28   : > { %2468 = vmatmul.mubr.f32.vlgmr.msra.gmra.mrb[0].mxu0 %v359_v61  ;;  %v2781_v61 = vpack.c.bf16 %v669_v55, %v666_v53 }
  0x29   : > { %2470 = vmatprep.mubr.f32.mxu0 %v360_v0  ;;  %2766 = vmatpush1.bf16.msra.mxu0 %v2765_v2  ;;  %v2783_v0 = vpack.c.bf16 %v676_v60, %v673_v59  ;;  %v674_v2 = vld [vmem:[%s4401_s2 + $0x480] sm:$0xff] }
  0x2a   : > { %2768 = vmatprep.subr.bf16.mxu0 %v2767_v5  ;;  %2512 = vmatmul.mubr.f32.vlgmr.msra.gmra.mrb[0].mxu1 %v501_v15  ;;  %v682_v5 = vld [vmem:[%s4401_s2 + $0x5c8] sm:$0xff]  ;;  %v685_v15 = vld [vmem:[%s4401_s2 + $0x638] sm:$0xff] }
  0x2b   : > { %2514 = vmatprep.mubr.f32.mxu1 %v502_v19  ;;  %2798 = vmatpush3.bf16.msra.mxu1 %v2795_v7  ;;  %v2815_v7 = vpack.c.bf16 %v677_v3, %v674_v2  ;;  %v2791_v17 = vpack.c.bf16 %v688_v16, %v685_v15  ;;  %v687_v19 = vld [vmem:[%s4401_s2 + $0x6a0] sm:$0xff]  ;;  %v996_v3 = vld [vmem:[%s4401_s2 + $0x30] sm:$0xff]  ;;  %v1001_v15 = vld [vmem:[%s4401_s2 + $0x108] sm:$0xff] }
  0x2c   : > { %2471 = vmatmul.mubr.f32.gmra.mrb[2].mxu0 %v361_v9  ;;  %2800 = vmatprep.subr.bf16.mxu1 %v2799_v23  ;;  %v2787_v9 = vpack.c.bf16 %v682_v5, %v679_v4  ;;  %v2793_v20 = vpack.c.bf16 %v687_v19, %v684_v18  ;;  %v999_v4 = vld [vmem:[%s4401_s2 + $0xa0] sm:$0xff]  ;;  %v1004_v16 = vld [vmem:[%s4401_s2 + $0x178] sm:$0xff]  ;;  %v1006_v19 = vld [vmem:[%s4401_s2 + $0x188] sm:$0xff] }
  0x2d   : > { %2473 = vmatprep.mubr.f32.mxu0 %v362_v13  ;;  %2770 = vmatpush1.bf16.msra.mxu0 %v2769_v22  ;;  %v2789_v13 = vpack.c.bf16 %v681_v10, %v678_v8  ;;  %v689_v22 = vld [vmem:[%s4401_s2 + $0x6b0] sm:$0xff]  ;;  %v2827_v5 = vpack.c.bf16 %v999_v4, %v996_v3  ;;  %v997_v8 = vld [vmem:[%s4401_s2 + $0x38] sm:$0xff]  ;;  %v1000_v10 = vld [vmem:[%s4401_s2 + $0xa8] sm:$0xff] }
  0x2e   : > { %2772 = vmatprep.subr.bf16.mxu0 %v2771_v26  ;;  %2515 = vmatmul.mubr.f32.gmra.mrb[2].mxu1 %v503_v32  ;;  %v2859_v11 = vpack.c.bf16 %v1000_v10, %v997_v8  ;;  %v1003_v18 = vld [vmem:[%s4401_s2 + $0x118] sm:$0xff]  ;;  %v1035_v3 = vld [vmem:[%s4401_s2 + $0x5e0] sm:$0xff] }
  0x2f   : > { %2517 = vmatprep.mubr.f32.mxu1 %v504_v35  ;;  %2802 = vmatpush3.bf16.msra.mxu1 %v2799_v23  ;;  %v2823_v23 = vpack.c.bf16 %v689_v22, %v686_v21  ;;  %v1008_v21 = vld [vmem:[%s4401_s2 + $0x1f0] sm:$0xff]  ;;  %v1011_v22 = vld [vmem:[%s4401_s2 + $0x260] sm:$0xff] }
  0x30   : > { %2474 = vmatmul.mubr.f32.gmra.mrb[4].mxu0 %v363_v25  ;;  %2804 = vmatprep.subr.bf16.mxu1 %v2803_v39  ;;  %v2282_v25 = vld [vmem:[%s4402_s3] ss:$0 sm:$0xff] }
  0x31   : > { %2476 = vmatprep.mubr.f32.mxu0 %v364_v30  ;;  %2774 = vmatpush1.bf16.msra.mxu0 %v2773_v38  ;;  %v3350_v30 = vld [vmem:[%s4402_s3 + $0x1] ss:$0 sm:$0xff] }
  0x32   : > { %2776 = vmatprep.subr.bf16.mxu0 %v2775_v42  ;;  %2518 = vmatmul.mubr.f32.gmra.mrb[4].mxu1 %v505_v46 }
  0x33   : > { %2520 = vmatprep.mubr.f32.mxu1 %v506_v49  ;;  %2806 = vmatpush3.bf16.msra.mxu1 %v2803_v39 }
  0x34   : > { %2477 = vmatmul.mubr.f32.gmra.mrb[6].mxu0 %v365_v41  ;;  %2808 = vmatprep.subr.bf16.mxu1 %v2807_v52 }
  0x35   : > { %2778 = vmatpush1.bf16.msra.mxu0 %v2777_v51  ;;  %754 = vmatprep.mubr.f32.mxu0 %v3038_v24 }
  0x36   : > { %2780 = vmatprep.subr.bf16.mxu0 %v2779_v54  ;;  %2521 = vmatmul.mubr.f32.gmra.mrb[6].mxu1 %v507_v58 }
  0x37   : > { %2810 = vmatpush3.bf16.msra.mxu1 %v2807_v52 }
  0x38   : > { %2812 = vmatprep.subr.bf16.mxu1 %v2811_v62 }
  0x39   : > { %2782 = vmatpush1.bf16.msra.mxu0 %v2781_v61 }
  0x3a   : > { %2784 = vmatprep.subr.bf16.mxu0 %v2783_v0 }
  0x3b   : > { %2814 = vmatpush3.bf16.msra.mxu1 %v2811_v62 }
  0x3c   : > { %2816 = vmatprep.subr.bf16.mxu1 %v2815_v7 }
  0x3d   : > { %2786 = vmatpush1.bf16.msra.mxu0 %v2785_v6  ;;  %v995_v6 = vld [vmem:[%s4401_s2 + $0x28] sm:$0xff] }
  0x3e   : > { %2788 = vmatprep.subr.bf16.mxu0 %v2787_v9 }
  0x3f   : > { %2818 = vmatpush3.bf16.msra.mxu1 %v2815_v7  ;;  %v998_v7 = vld [vmem:[%s4401_s2 + $0x98] sm:$0xff] }
  0x40   : > { %2820 = vmatprep.subr.bf16.mxu1 %v2819_v14  ;;  %v2829_v9 = vpack.c.bf16 %v998_v7, %v995_v6  ;;  %v1034_v6 = vld [vmem:[%s4401_s2 + $0x5d8] sm:$0xff] }
  0x41   : > { %2790 = vmatpush1.bf16.msra.mxu0 %v2789_v13  ;;  %v1005_v13 = vld [vmem:[%s4401_s2 + $0x180] sm:$0xff]  ;;  %v1033_v7 = vld [vmem:[%s4401_s2 + $0x578] sm:$0xff] }
  0x42   : > { %2792 = vmatprep.subr.bf16.mxu0 %v2791_v17  ;;  %v2833_v17 = vpack.c.bf16 %v1004_v16, %v1001_v15  ;;  %v1040_v15 = vld [vmem:[%s4401_s2 + $0x6b8] sm:$0xff] }
  0x43   : > { %2822 = vmatpush3.bf16.msra.mxu1 %v2819_v14  ;;  %v2831_v14 = vpack.c.bf16 %v1005_v13, %v1002_v12  ;;  %v1041_v12 = vld [vmem:[%s4401_s2 + $0x6c0] sm:$0xff]  ;;  %v1039_v16 = vld [vmem:[%s4401_s2 + $0x658] sm:$0xff] }
  0x44   : > { %2824 = vmatprep.subr.bf16.mxu1 %v2823_v23 }
  0x45   : > { %2794 = vmatpush1.bf16.msra.mxu0 %v2793_v20  ;;  %v2863_v20 = vpack.c.bf16 %v1006_v19, %v1003_v18  ;;  %v1042_v18 = vld [vmem:[%s4401_s2 + $0x6c8] sm:$0xff] }
  0x46   : > { %2828 = vmatprep.subr.bf16.mxu0 %v2827_v5  ;;  %v1031_v5 = vld [vmem:[%s4401_s2 + $0x568] sm:$0xff]  ;;  %v2887_v19 = vpack.c.bf16 %v1042_v18, %v1039_v16 }
  0x47   : > { %2826 = vmatpush3.bf16.msra.mxu1 %v2823_v23  ;;  %v2835_v23 = vpack.c.bf16 %v1011_v22, %v1008_v21  ;;  %v2853_v8 = vpack.c.bf16 %v1034_v6, %v1031_v5 }
  0x48   : > { %2860 = vmatprep.subr.bf16.mxu1 %v2859_v11 }
  0xfb   : > { %v2469_v26 = vpop.f32.mrb[0].mxu0 }
  0xfc   : > { %v459_v27 = vadd.f32 %v2469_v26, %v2282_v25  ;;  %v453_v28 = vpop.f32.mrb[1].mxu0  ;;  %v1010_v26 = vld [vmem:[%s4401_s2 + $0x258] sm:$0xff] }
  0xfd   : > { %v454_v29 = vadd.f32 %v2282_v25, %v453_v28  ;;  %v2513_v36 = vpop.f32.mrb[0].mxu1 }
  0xfe   : > { %v635_v33 = vmax.f32 %v459_v27, 0.0  ;;  %v3353_v38 = vadd.f32 %v2513_v36, %v3350_v30  ;;  %v595_v39 = vpop.f32.mrb[1].mxu1  ;;  %v1009_v27 = vld [vmem:[%s4401_s2 + $0x1f8] sm:$0xff] }
  0xff   : > { %v634_v31 = vmax.f32 %v454_v29, 0.0  ;;  %v2472_v32 = vpop.f32.mrb[2].mxu0  ;;  %v3359_v43 = vadd.f32 %v3350_v30, %v595_v39  ;;  %v1012_v29 = vld [vmem:[%s4401_s2 + $0x268] sm:$0xff]  ;;  %v1015_v36 = vld [vmem:[%s4401_s2 + $0x2d8] sm:$0xff] }
 0x100   : > { %v469_v34 = vadd.f32 %v2472_v32, %v2282_v25  ;;  %v463_v35 = vpop.f32.mrb[3].mxu0  ;;  %1372 = vrot.lane.b32.xlu1 %v3353_v38, %s3039_s27  ;;  %1348 = vrot.lane.b32.xlu0 %v3353_v38, %s3040_s28  ;;  %v1017_v32 = vld [vmem:[%s4401_s2 + $0x340] sm:$0xff]  ;;  %v1018_v39 = vld [vmem:[%s4401_s2 + $0x348] sm:$0xff] }
 0x101   : > { %v464_v37 = vadd.f32 %v2282_v25, %v463_v35  ;;  %755 = vmatmul.mubr.f32.vlgmr.msra.gmra.mrb[8].mxu0 %v634_v31  ;;  %2555 = vmatprep.mubr.f32.mxu1 %v634_v31  ;;  %v2516_v46 = vpop.f32.mrb[2].mxu1  ;;  %v1014_v31 = vld [vmem:[%s4401_s2 + $0x2d0] sm:$0xff]  ;;  %v1016_v35 = vld [vmem:[%s4401_s2 + $0x338] sm:$0xff] }
 0x102   : > { %v637_v40 = vmax.f32 %v469_v34, 0.0  ;;  %2556 = vmatmul.mubr.f32.vlgmr.msra.gmra.mrb[8].mxu1 %v635_v33  ;;  %760 = vmatprep.mubr.f32.mxu0 %v3038_v24  ;;  %v3364_v48 = vadd.f32 %v2516_v46, %v3350_v30  ;;  %v605_v49 = vpop.f32.mrb[3].mxu1  ;;  %v1013_v34 = vld [vmem:[%s4401_s2 + $0x2c8] sm:$0xff]  ;;  %v1022_v46 = vld [vmem:[%s4401_s2 + $0x418] sm:$0xff] }
 0x103   : > { %v636_v41 = vmax.f32 %v464_v37, 0.0  ;;  %v2475_v42 = vpop.f32.mrb[4].mxu0  ;;  %v3375_v60 = vadd.f32 %v3350_v30, %v605_v49  ;;  %2830 = vmatpush1.bf16.msra.mxu0 %v2829_v9  ;;  %2862 = vmatpush3.bf16.msra.mxu1 %v2859_v11  ;;  %v2841_v37 = vpack.c.bf16 %v1016_v35, %v1013_v34  ;;  %v1036_v9 = vld [vmem:[%s4401_s2 + $0x5e8] sm:$0xff]  ;;  %v1038_v11 = vld [vmem:[%s4401_s2 + $0x650] sm:$0xff] }
 0x104   : > { %v479_v44 = vadd.f32 %v2475_v42, %v2282_v25  ;;  %v473_v45 = vpop.f32.mrb[5].mxu0  ;;  %1352 = vrot.lane.b32.xlu1 %v3364_v48, %s3040_s28  ;;  %1346 = vrot.lane.b32.xlu0 %v3359_v43, %s3040_s28  ;;  %v1023_v42 = vld [vmem:[%s4401_s2 + $0x420] sm:$0xff]  ;;  %v2883_v10 = vpack.c.bf16 %v1036_v9, %v1033_v7  ;;  %v2855_v13 = vpack.c.bf16 %v1041_v12, %v1038_v11 }
 0x105   : > { %v474_v47 = vadd.f32 %v2282_v25, %v473_v45  ;;  %761 = vmatmul.mubr.f32.gmra.mrb[10].mxu0 %v635_v33  ;;  %2558 = vmatprep.mubr.f32.mxu1 %v636_v41  ;;  %v2519_v55 = vpop.f32.mrb[4].mxu1  ;;  %v2839_v33 = vpack.c.bf16 %v1017_v32, %v1014_v31  ;;  %v1019_v45 = vld [vmem:[%s4401_s2 + $0x3a8] sm:$0xff] }
 0x106   : > { %v639_v50 = vmax.f32 %v479_v44, 0.0  ;;  %2559 = vmatmul.mubr.f32.gmra.mrb[10].mxu1 %v637_v40  ;;  %766 = vmatprep.mubr.f32.mxu0 %v3038_v24  ;;  %v615_v57 = vpop.f32.mrb[5].mxu1  ;;  %v3383_v63 = vadd.f32 %v2519_v55, %v3350_v30  ;;  %v2845_v49 = vpack.c.bf16 %v1022_v46, %v1019_v45  ;;  %v1025_v55 = vld [vmem:[%s4401_s2 + $0x488] sm:$0xff] }
 0x107   : > { %v638_v51 = vmax.f32 %v474_v47, 0.0  ;;  %v2478_v52 = vpop.f32.mrb[6].mxu0  ;;  %v3388_v0 = vadd.f32 %v3350_v30, %v615_v57  ;;  %2832 = vmatprep.subr.bf16.mxu0 %v2831_v14  ;;  %2864 = vmatprep.subr.bf16.mxu1 %v2863_v20  ;;  %v1021_v47 = vld [vmem:[%s4401_s2 + $0x3b8] sm:$0xff]  ;;  %v1037_v14 = vld [vmem:[%s4401_s2 + $0x648] sm:$0xff] }
 0x108   : > { %v489_v53 = vadd.f32 %v2478_v52, %v2282_v25  ;;  %v483_v54 = vpop.f32.mrb[7].mxu0  ;;  %1376 = vrot.lane.b32.xlu1 %v3364_v48, %s3039_s27  ;;  %1370 = vrot.lane.b32.xlu0 %v3359_v43, %s3039_s27  ;;  %v1026_v52 = vld [vmem:[%s4401_s2 + $0x490] sm:$0xff]  ;;  %v1027_v57 = vld [vmem:[%s4401_s2 + $0x498] sm:$0xff] }
 0x109   : > { %v484_v56 = vadd.f32 %v2282_v25, %v483_v54  ;;  %767 = vmatmul.mubr.f32.gmra.mrb[12].mxu0 %v636_v41  ;;  %2561 = vmatprep.mubr.f32.mxu1 %v638_v51  ;;  %v2522_v61 = vpop.f32.mrb[6].mxu1  ;;  %v1007_v25 = vld [vmem:[%s4401_s2 + $0x1e8] sm:$0xff]  ;;  %v1020_v41 = vld [vmem:[%s4401_s2 + $0x3b0] sm:$0xff] }
 0x10a   : > { %v641_v58 = vmax.f32 %v489_v53, 0.0  ;;  %2562 = vmatmul.mubr.f32.gmra.mrb[12].mxu1 %v639_v50  ;;  %772 = vmatprep.mubr.f32.mxu0 %v3038_v24  ;;  %v625_v62 = vpop.f32.mrb[7].mxu1  ;;  %v3399_v1 = vadd.f32 %v2522_v61, %v3350_v30  ;;  %v2837_v28 = vpack.c.bf16 %v1010_v26, %v1007_v25  ;;  %v2843_v44 = vpack.c.bf16 %v1023_v42, %v1020_v41  ;;  %v1029_v53 = vld [vmem:[%s4401_s2 + $0x500] sm:$0xff] }
 0x10b   : > { %v640_v59 = vmax.f32 %v484_v56, 0.0  ;;  %v3404_v2 = vadd.f32 %v3350_v30, %v625_v62  ;;  %2834 = vmatpush1.bf16.msra.mxu0 %v2833_v17  ;;  %2866 = vmatpush3.bf16.msra.mxu1 %v2863_v20  ;;  %v2867_v30 = vpack.c.bf16 %v1012_v29, %v1009_v27  ;;  %v2847_v54 = vpack.c.bf16 %v1029_v53, %v1026_v52  ;;  %v1028_v56 = vld [vmem:[%s4401_s2 + $0x4f8] sm:$0xff]  ;;  %v1032_v62 = vld [vmem:[%s4401_s2 + $0x570] sm:$0xff] }
 0x10c   : > { %1350 = vrot.lane.b32.xlu1 %v3375_v60, %s3040_s28  ;;  %1374 = vrot.lane.b32.xlu0 %v3375_v60, %s3039_s27  ;;  %v2851_v4 = vpack.c.bf16 %v1035_v3, %v1032_v62  ;;  %v2857_v17 = vpack.c.bf16 %v1040_v15, %v1037_v14  ;;  %v225_v20 = vlaneseq }
 0x10d   : > { %773 = vmatmul.mubr.f32.gmra.mrb[14].mxu0 %v637_v40  ;;  %2564 = vmatprep.mubr.f32.mxu1 %v640_v59  ;;  %v2871_v40 = vpack.c.bf16 %v1018_v39, %v1015_v36 }
 0x10e   : > { %2565 = vmatmul.mubr.f32.gmra.mrb[14].mxu1 %v641_v58  ;;  %778 = vmatprep.mubr.f32.mxu0 %v3038_v24  ;;  %v3561_v21 = vshrl.u32 %v225_v20, 7 }
 0x10f   : > { %2836 = vmatprep.subr.bf16.mxu0 %v2835_v23  ;;  %2868 = vmatprep.subr.bf16.mxu1 %v2867_v30 }
 0x110   : > { %1356 = vrot.lane.b32.xlu1 %v3383_v63, %s3040_s28  ;;  %1354 = vrot.lane.b32.xlu0 %v3388_v0, %s3040_s28  ;;  %v227_v26 = vadd.s32 8, %v3561_v21  ;;  %vm949_vm0 = vcmp.lt.s32.totalorder %v3561_v21, 7  ;;  %vm916_vm1 = vcmp.lt.s32.totalorder %v3561_v21, 1  ;;  %v229_v41 = vadd.s32 24, %v3561_v21 }
 0x111   : > { %779 = vmatmul.mubr.f32.gmra.mrb[16].mxu0 %v638_v51  ;;  %2870 = vmatpush3.bf16.msra.mxu1 %v2867_v30  ;;  %v228_v30 = vadd.s32 16, %v3561_v21 }
 0x112   : > { %784 = vmatprep.mubr.f32.mxu0 %v3038_v24  ;;  %2838 = vmatpush1.bf16.msra.mxu0 %v2837_v28 }
 0x113   : > { %2840 = vmatprep.subr.bf16.mxu0 %v2839_v33  ;;  %2872 = vmatprep.subr.bf16.mxu1 %v2871_v40  ;;  %v252_v45 = vand.u32 15, %v228_v30  ;;  %v232_v30 = vadd.s32 48, %v3561_v21 }
 0x114   : > { %1380 = vrot.lane.b32.xlu1 %v3383_v63, %s3039_s27  ;;  %1378 = vrot.lane.b32.xlu0 %v3388_v0, %s3039_s27 }
 0x115   : > { %785 = vmatmul.mubr.f32.gmra.mrb[18].mxu0 %v639_v50  ;;  %2874 = vmatpush3.bf16.msra.mxu1 %v2871_v40  ;;  %v1024_v50 = vld [vmem:[%s4401_s2 + $0x428] sm:$0xff]  ;;  %vm3594_vm3 = vcmp.eq.s32.totalorder %v252_v45, 0 }
 0x116   : > { %790 = vmatprep.mubr.f32.mxu0 %v3038_v24  ;;  %2842 = vmatpush1.bf16.msra.mxu0 %v2841_v37  ;;  %v2875_v51 = vpack.c.bf16 %v1024_v50, %v1021_v47  ;;  %v245_v37 = vand.u32 15, %v227_v26 }
 0x117   : > { %2844 = vmatprep.subr.bf16.mxu0 %v2843_v44 }
 0x118   : > { %1360 = vrot.lane.b32.xlu1 %v3399_v1, %s3040_s28  ;;  %1358 = vrot.lane.b32.xlu0 %v3404_v2, %s3040_s28  ;;  %vm3582_vm2 = vcmp.eq.s32.totalorder %v245_v37, 15 }
 0x119   : > { %791 = vmatmul.mubr.f32.gmra.mrb[20].mxu0 %v640_v59  ;;  %2876 = vmatprep.subr.bf16.mxu1 %v2875_v51  ;;  %v1030_v59 = vld [vmem:[%s4401_s2 + $0x508] sm:$0xff] }
 0x11a   : > { %796 = vmatprep.mubr.f32.mxu0 %v3038_v24  ;;  %2846 = vmatpush1.bf16.msra.mxu0 %v2845_v49  ;;  %v2879_v61 = vpack.c.bf16 %v1030_v59, %v1027_v57  ;;  %v230_v49 = vadd.s32 32, %v3561_v21  ;;  %v259_v59 = vand.u32 15, %v229_v41 }
 0x11b   : > { %2878 = vmatpush3.bf16.msra.mxu1 %v2875_v51  ;;  %2848 = vmatprep.subr.bf16.mxu0 %v2847_v54 }
 0x11c   : > { %1384 = vrot.lane.b32.xlu1 %v3399_v1, %s3039_s27  ;;  %1382 = vrot.lane.b32.xlu0 %v3404_v2, %s3039_s27  ;;  %v266_v7 = vand.u32 15, %v230_v49  ;;  %vm3604_vm4 = vcmp.eq.s32.totalorder %v259_v59, 15  ;;  %v280_v49 = vand.u32 15, %v232_v30 }
 0x11d   : > { %797 = vmatmul.mubr.f32.gmra.mrb[22].mxu0 %v641_v58  ;;  %v2849_v58 = vpack.c.bf16 %v1028_v56, %v1025_v55  ;;  %2880 = vmatprep.subr.bf16.mxu1 %v2879_v61 }
 0x11e   : > { %1107 = vmatprep.mubr.f32.mxu0 %v3038_v24  ;;  %vm3613_vm5 = vcmp.eq.s32.totalorder %v266_v7, 0  ;;  %vm3639_vm7 = vcmp.eq.s32.totalorder %v280_v49, 0  ;;  %v1486_v49 = vld [vmem:[%s4401_s2 + $0xb8] sm:$0xff] }
 0x11f   : > { %2850 = vmatpush1.bf16.msra.mxu0 %v2849_v58  ;;  %2882 = vmatpush3.bf16.msra.mxu1 %v2879_v61 }
 0x120   : > { %2852 = vmatprep.subr.bf16.mxu0 %v2851_v4  ;;  %2884 = vmatprep.subr.bf16.mxu1 %v2883_v10 }
 0x123   : > { %2854 = vmatpush1.bf16.msra.mxu0 %v2853_v8  ;;  %2886 = vmatpush3.bf16.msra.mxu1 %v2883_v10 }
 0x124   : > { %2856 = vmatprep.subr.bf16.mxu0 %v2855_v13  ;;  %2888 = vmatprep.subr.bf16.mxu1 %v2887_v19 }
 0x127   : > { %2858 = vmatpush1.bf16.msra.mxu0 %v2857_v17  ;;  %2890 = vmatpush3.bf16.msra.mxu1 %v2887_v19  ;;  %v231_v17 = vadd.s32 40, %v3561_v21 }
 0x129   : > { %v273_v41 = vand.u32 15, %v231_v17 }
 0x12b   : > { %vm3630_vm6 = vcmp.eq.s32.totalorder %v273_v41, 15 }
 0x1d4   : > { %v3563_v22 = vpop.f32.mrb[8].mxu0 }
 0x1d5   : > { %v3565_v23 = vpop.f32.mrb[9].mxu0  ;;  %v2557_v25 = vpop.f32.mrb[8].mxu1  ;;  %v908_v32 = vrot.slane %v3563_v22, 7 }
 0x1d6   : > { %v942_v27 = vrot.slane %v2557_v25, 1  ;;  %v869_v28 = vpop.f32.mrb[9].mxu1 }
 0x1d7   : > { %v941_v29 = vrot.slane %v869_v28, 1 }
 0x1d8   : > { %v762_v31 = vpop.f32.mrb[10].mxu0 }
 0x1d9   : > { %v3573_v33 = vsel %vm949_vm0, %v941_v29, %v942_v27  ;;  %v909_v34 = vrot.slane %v762_v31, 7  ;;  %v764_v35 = vpop.f32.mrb[11].mxu0  ;;  %v2560_v36 = vpop.f32.mrb[10].mxu1 }
 0x1da   : > { %v944_v39 = vrot.slane %v2560_v36, 1  ;;  %v879_v40 = vpop.f32.mrb[11].mxu1 }
 0x1db   : > { %v923_v42 = vsel %vm916_vm1, %v908_v32, %v909_v34  ;;  %v943_v44 = vrot.slane %v879_v40, 1 }
 0x1dc   : > { %v934_v46 = vadd.f32 %v923_v42, %v764_v35  ;;  %v768_v47 = vpop.f32.mrb[12].mxu0 }
 0x1dd   : > { %v955_v51 = vsel %vm949_vm0, %v942_v27, %v943_v44  ;;  %v910_v52 = vrot.slane %v768_v47, 7  ;;  %v770_v53 = vpop.f32.mrb[13].mxu0  ;;  %v954_v54 = vsel %vm949_vm0, %v943_v44, %v944_v39  ;;  %v2563_v55 = vpop.f32.mrb[12].mxu1 }
 0x1de   : > { %v959_v56 = vsel %vm3582_vm2, 0.0, %v955_v51  ;;  %v946_v57 = vrot.slane %v2563_v55, 1  ;;  %v889_v58 = vpop.f32.mrb[13].mxu1 }
 0x1df   : > { %v3592_v61 = vadd.f32 %v959_v56, %v934_v46  ;;  %v922_v3 = vsel %vm916_vm1, %v909_v34, %v910_v52  ;;  %v945_v4 = vrot.slane %v889_v58, 1  ;;  %v233_v56 = vadd.s32 56, %v3561_v21 }
 0x1e0   : > { %v927_v5 = vsel %vm3594_vm3, 0.0, %v922_v3  ;;  %v774_v6 = vpop.f32.mrb[14].mxu0 }
 0x1e1   : > { %v935_v8 = vadd.f32 %v927_v5, %v770_v53  ;;  %v911_v9 = vrot.slane %v774_v6, 7  ;;  %v776_v10 = vpop.f32.mrb[15].mxu0  ;;  %v953_v11 = vsel %vm949_vm0, %v944_v39, %v945_v4  ;;  %v2566_v12 = vpop.f32.mrb[14].mxu1  ;;  %v952_v16 = vsel %vm949_vm0, %v945_v4, %v946_v57 }
 0x1e2   : > { %v948_v14 = vrot.slane %v2566_v12, 1  ;;  %v899_v15 = vpop.f32.mrb[15].mxu1  ;;  %v961_v34 = vsel %vm3604_vm4, 0.0, %v953_v11  ;;  %v238_v6 = vand.u32 15, %v3561_v21 }
 0x1e3   : > { %v968_v18 = vadd.f32 %v954_v54, %v935_v8  ;;  %v921_v19 = vsel %vm916_vm1, %v910_v52, %v911_v9  ;;  %v947_v25 = vrot.slane %v899_v15, 1 }
 0x1e4   : > { %v936_v26 = vadd.f32 %v921_v19, %v776_v10  ;;  %v780_v27 = vpop.f32.mrb[16].mxu0  ;;  %v957_v31 = vsel %vm949_vm0, %v948_v14, %v941_v29  ;;  %vm3648_vm8 = vcmp.eq.s32.totalorder %v238_v6, 0  ;;  %v1488_v6 = vld [vmem:[%s4401_s2 + $0x120] sm:$0xff] }
 0x1e5   : > { %v912_v35 = vrot.slane %v780_v27, 7  ;;  %v782_v36 = vpop.f32.mrb[17].mxu0  ;;  %v951_v37 = vsel %vm949_vm0, %v946_v57, %v947_v25  ;;  %v950_v39 = vsel %vm949_vm0, %v947_v25, %v948_v14  ;;  %v2284_v27 = vld [vmem:[%s4402_s3 + $0x2] ss:$0 sm:$0xff] }
 0x1e6   : > { %v969_v40 = vadd.f32 %v961_v34, %v936_v26  ;;  %v963_v57 = vsel %vm3630_vm6, 0.0, %v951_v37  ;;  %v981_v37 = vadd.f32 %v2284_v27, %v968_v18 }
 0x1e7   : > { %v920_v42 = vsel %vm916_vm1, %v911_v9, %v912_v35  ;;  %v287_v9 = vand.u32 15, %v233_v56 }
 0x1e8   : > { %v929_v44 = vsel %vm3613_vm5, 0.0, %v920_v42  ;;  %v786_v29 = vpop.f32.mrb[18].mxu0  ;;  %v982_v42 = vadd.f32 %v2284_v27, %v969_v40 }
 0x1e9   : > { %v937_v45 = vadd.f32 %v929_v44, %v782_v36  ;;  %v913_v46 = vrot.slane %v786_v29, 7  ;;  %v788_v47 = vpop.f32.mrb[19].mxu0  ;;  %vm3660_vm9 = vcmp.eq.s32.totalorder %v287_v9, 15  ;;  %v989_v44 = vmax.f32 %v981_v37, 0.0  ;;  %v1503_v37 = vld [vmem:[%s4401_s2 + $0x350] sm:$0xff] }
 0x1eb   : > { %v970_v52 = vadd.f32 %v952_v16, %v937_v45  ;;  %v919_v53 = vsel %vm916_vm1, %v912_v35, %v913_v46  ;;  %v980_v35 = vadd.f32 %v2284_v27, %v3592_v61 }
 0x1ec   : > { %v938_v54 = vadd.f32 %v919_v53, %v788_v47  ;;  %v792_v55 = vpop.f32.mrb[20].mxu0  ;;  %v1483_v47 = vld [vmem:[%s4401_s2 + $0x48] sm:$0xff]  ;;  %v1482_v53 = vld [vmem:[%s4401_s2 + $0x40] sm:$0xff] }
 0x1ed   : > { %v914_v58 = vrot.slane %v792_v55, 7  ;;  %v794_v3 = vpop.f32.mrb[21].mxu0  ;;  %v988_v41 = vmax.f32 %v980_v35, 0.0  ;;  %v983_v29 = vadd.f32 %v2284_v27, %v970_v52  ;;  %v2891_v52 = vpack.c.bf16 %v1486_v49, %v1483_v47  ;;  %v1484_v55 = vld [vmem:[%s4401_s2 + $0x50] sm:$0xff]  ;;  %v1513_v47 = vld [vmem:[%s4401_s2 + $0x4a8] sm:$0xff]  ;;  %v1516_v49 = vld [vmem:[%s4401_s2 + $0x518] sm:$0xff] }
 0x1ee   : > { %v971_v4 = vadd.f32 %v963_v57, %v938_v54  ;;  %v1485_v54 = vld [vmem:[%s4401_s2 + $0xb0] sm:$0xff]  ;;  %v1487_v57 = vld [vmem:[%s4401_s2 + $0xc0] sm:$0xff] }
 0x1ef   : > { %v918_v5 = vsel %vm916_vm1, %v913_v46, %v914_v58  ;;  %v991_v45 = vmax.f32 %v983_v29, 0.0  ;;  %v2893_v56 = vpack.c.bf16 %v1485_v54, %v1482_v53  ;;  %2892 = vmatprep.subr.bf16.mxu0 %v2891_v52  ;;  %v1507_v29 = vld [vmem:[%s4401_s2 + $0x3c8] sm:$0xff]  ;;  %v2911_v52 = vpack.c.bf16 %v1516_v49, %v1513_v47  ;;  %v1512_v53 = vld [vmem:[%s4401_s2 + $0x4a0] sm:$0xff]  ;;  %v1515_v54 = vld [vmem:[%s4401_s2 + $0x510] sm:$0xff] }
 0x1f0   : > { %v931_v7 = vsel %vm3639_vm7, 0.0, %v918_v5  ;;  %v798_v8 = vpop.f32.mrb[22].mxu0 }
 0x1f1   : > { %v939_v10 = vadd.f32 %v931_v7, %v794_v3  ;;  %v915_v11 = vrot.slane %v798_v8, 7  ;;  %v800_v12 = vpop.f32.mrb[23].mxu0  ;;  %v1489_v3 = vld [vmem:[%s4401_s2 + $0x128] sm:$0xff]  ;;  %v1491_v7 = vld [vmem:[%s4401_s2 + $0x190] sm:$0xff] }
 0x1f2   : > { %v1490_v8 = vld [vmem:[%s4401_s2 + $0x130] sm:$0xff]  ;;  %v2897_v9 = vpack.c.bf16 %v1491_v7, %v1488_v6  ;;  %v1518_v6 = vld [vmem:[%s4401_s2 + $0x580] sm:$0xff] }
 0x1f3   : > { %v972_v14 = vadd.f32 %v950_v39, %v939_v10  ;;  %v924_v16 = vsel %vm916_vm1, %v915_v11, %v908_v32  ;;  %v917_v17 = vsel %vm916_vm1, %v914_v58, %v915_v11  ;;  %v965_v32 = vsel %vm3660_vm9, 0.0, %v957_v31  ;;  %v1493_v10 = vld [vmem:[%s4401_s2 + $0x1a0] sm:$0xff]  ;;  %v1521_v7 = vld [vmem:[%s4401_s2 + $0x5f0] sm:$0xff] }
 0x1f4   : > { %v925_v19 = vsel %vm3648_vm8, 0.0, %v924_v16  ;;  %v940_v26 = vadd.f32 %v917_v17, %v800_v12  ;;  %v984_v31 = vadd.f32 %v2284_v27, %v971_v4  ;;  %v2923_v58 = vpack.c.bf16 %v1487_v57, %v1484_v55  ;;  %v1492_v4 = vld [vmem:[%s4401_s2 + $0x198] sm:$0xff]  ;;  %v1495_v12 = vld [vmem:[%s4401_s2 + $0x208] sm:$0xff]  ;;  %v1494_v17 = vld [vmem:[%s4401_s2 + $0x200] sm:$0xff] }
 0x1f5   : > { %v933_v22 = vadd.f32 %v925_v19, %v3565_v23  ;;  %v990_v23 = vmax.f32 %v982_v42, 0.0  ;;  %v2895_v5 = vpack.c.bf16 %v1492_v4, %v1489_v3  ;;  %v2927_v11 = vpack.c.bf16 %v1493_v10, %v1490_v8  ;;  %v1497_v19 = vld [vmem:[%s4401_s2 + $0x270] sm:$0xff]  ;;  %v1505_v42 = vld [vmem:[%s4401_s2 + $0x360] sm:$0xff]  ;;  %v1519_v3 = vld [vmem:[%s4401_s2 + $0x588] sm:$0xff] }
 0x1f6   : > { %v973_v30 = vadd.f32 %v965_v32, %v940_v26  ;;  %v992_v61 = vmax.f32 %v984_v31, 0.0  ;;  %2924 = vmatprep.subr.bf16.mxu1 %v2923_v58  ;;  %v1496_v26 = vld [vmem:[%s4401_s2 + $0x210] sm:$0xff]  ;;  %v1517_v57 = vld [vmem:[%s4401_s2 + $0x520] sm:$0xff]  ;;  %v1522_v4 = vld [vmem:[%s4401_s2 + $0x5f8] sm:$0xff] }
 0x1f7   : > { %v966_v34 = vadd.f32 %v3573_v33, %v933_v22  ;;  %v985_v33 = vadd.f32 %v2284_v27, %v972_v14  ;;  %v1498_v14 = vld [vmem:[%s4401_s2 + $0x278] sm:$0xff]  ;;  %v1499_v22 = vld [vmem:[%s4401_s2 + $0x280] sm:$0xff]  ;;  %v1514_v55 = vld [vmem:[%s4401_s2 + $0x4b0] sm:$0xff] }
 0x1f8   : > { %v986_v18 = vadd.f32 %v2284_v27, %v973_v30  ;;  %v2899_v16 = vpack.c.bf16 %v1498_v14, %v1495_v12  ;;  %v2931_v32 = vpack.c.bf16 %v1499_v22, %v1496_v26  ;;  %v1501_v30 = vld [vmem:[%s4401_s2 + $0x2e8] sm:$0xff]  ;;  %v1520_v8 = vld [vmem:[%s4401_s2 + $0x590] sm:$0xff]  ;;  %v1523_v10 = vld [vmem:[%s4401_s2 + $0x600] sm:$0xff] }
 0x1f9   : > { %v979_v36 = vadd.f32 %v2284_v27, %v966_v34  ;;  %v993_v40 = vmax.f32 %v985_v33, 0.0  ;;  %v2901_v27 = vpack.c.bf16 %v1497_v19, %v1494_v17  ;;  %v1504_v34 = vld [vmem:[%s4401_s2 + $0x358] sm:$0xff]  ;;  %v1509_v33 = vld [vmem:[%s4401_s2 + $0x430] sm:$0xff]  ;;  %v1525_v12 = vld [vmem:[%s4401_s2 + $0x668] sm:$0xff] }
 0x1fa   : > { %v994_v46 = vmax.f32 %v986_v18, 0.0  ;;  %v2903_v35 = vpack.c.bf16 %v1504_v34, %v1501_v30  ;;  %v1528_v14 = vld [vmem:[%s4401_s2 + $0x6d8] sm:$0xff]  ;;  %v1524_v17 = vld [vmem:[%s4401_s2 + $0x660] sm:$0xff]  ;;  %v1527_v19 = vld [vmem:[%s4401_s2 + $0x6d0] sm:$0xff] }
 0x1fb   : > { %v987_v39 = vmax.f32 %v979_v36, 0.0  ;;  %v1500_v36 = vld [vmem:[%s4401_s2 + $0x2e0] sm:$0xff]  ;;  %v1526_v26 = vld [vmem:[%s4401_s2 + $0x670] sm:$0xff] }
 0x1fc   : > { %v1529_v22 = vld [vmem:[%s4401_s2 + $0x6e0] sm:$0xff] }
 0x1fd   : > { %1108 = vmatmul.mubr.f32.vlgmr.msra.gmra.mrb[24].mxu0 %v987_v39  ;;  %2599 = vmatprep.mubr.f32.mxu1 %v987_v39  ;;  %v1502_v39 = vld [vmem:[%s4401_s2 + $0x2f0] sm:$0xff] }
 0x1fe   : > { %2600 = vmatmul.mubr.f32.vlgmr.msra.gmra.mrb[16].mxu1 %v988_v41  ;;  %1113 = vmatprep.mubr.f32.mxu0 %v3038_v24 }
 0x1ff   : > { %2602 = vmatprep.mubr.f32.mxu1 %v989_v44  ;;  %2894 = vmatpush1.bf16.msra.mxu0 %v2893_v56  ;;  %v2913_v56 = vpack.c.bf16 %v1515_v54, %v1512_v53 }
 0x200   : > { %2926 = vmatpush3.bf16.msra.mxu1 %v2923_v58  ;;  %2896 = vmatprep.subr.bf16.mxu0 %v2895_v5  ;;  %v2943_v58 = vpack.c.bf16 %v1517_v57, %v1514_v55  ;;  %v2915_v5 = vpack.c.bf16 %v1522_v4, %v1519_v3 }
 0x201   : > { %1114 = vmatmul.mubr.f32.gmra.mrb[26].mxu0 %v988_v41  ;;  %2928 = vmatprep.subr.bf16.mxu1 %v2927_v11  ;;  %v2905_v41 = vpack.c.bf16 %v1503_v37, %v1500_v36 }
 0x202   : > { %2603 = vmatmul.mubr.f32.gmra.mrb[18].mxu1 %v990_v23  ;;  %1119 = vmatprep.mubr.f32.mxu0 %v3038_v24 }
 0x203   : > { %2605 = vmatprep.mubr.f32.mxu1 %v991_v45  ;;  %2898 = vmatpush1.bf16.msra.mxu0 %v2897_v9  ;;  %v2917_v9 = vpack.c.bf16 %v1521_v7, %v1518_v6 }
 0x204   : > { %2930 = vmatpush3.bf16.msra.mxu1 %v2927_v11  ;;  %2900 = vmatprep.subr.bf16.mxu0 %v2899_v16  ;;  %v2947_v11 = vpack.c.bf16 %v1523_v10, %v1520_v8  ;;  %v2919_v16 = vpack.c.bf16 %v1528_v14, %v1525_v12 }
 0x205   : > { %1120 = vmatmul.mubr.f32.gmra.mrb[28].mxu0 %v989_v44  ;;  %2932 = vmatprep.subr.bf16.mxu1 %v2931_v32  ;;  %v2935_v44 = vpack.c.bf16 %v1505_v42, %v1502_v39 }
 0x206   : > { %2606 = vmatmul.mubr.f32.gmra.mrb[20].mxu1 %v992_v61  ;;  %1125 = vmatprep.mubr.f32.mxu0 %v3038_v24 }
 0x207   : > { %2608 = vmatprep.mubr.f32.mxu1 %v993_v40  ;;  %2902 = vmatpush1.bf16.msra.mxu0 %v2901_v27  ;;  %v2921_v27 = vpack.c.bf16 %v1527_v19, %v1524_v17 }
 0x208   : > { %2934 = vmatpush3.bf16.msra.mxu1 %v2931_v32  ;;  %2904 = vmatprep.subr.bf16.mxu0 %v2903_v35  ;;  %v2951_v32 = vpack.c.bf16 %v1529_v22, %v1526_v26 }
 0x209   : > { %1126 = vmatmul.mubr.f32.gmra.mrb[30].mxu0 %v990_v23  ;;  %v1510_v23 = vld [vmem:[%s4401_s2 + $0x438] sm:$0xff]  ;;  %2936 = vmatprep.subr.bf16.mxu1 %v2935_v44 }
 0x20a   : > { %2609 = vmatmul.mubr.f32.gmra.mrb[22].mxu1 %v994_v46  ;;  %1131 = vmatprep.mubr.f32.mxu0 %v3038_v24  ;;  %v2907_v31 = vpack.c.bf16 %v1510_v23, %v1507_v29 }
 0x20b   : > { %2906 = vmatpush1.bf16.msra.mxu0 %v2905_v41 }
 0x20c   : > { %2938 = vmatpush3.bf16.msra.mxu1 %v2935_v44  ;;  %2908 = vmatprep.subr.bf16.mxu0 %v2907_v31 }
 0x20d   : > { %1132 = vmatmul.mubr.f32.gmra.mrb[32].mxu0 %v991_v45  ;;  %v1506_v45 = vld [vmem:[%s4401_s2 + $0x3c0] sm:$0xff] }
 0x20e   : > { %1137 = vmatprep.mubr.f32.mxu0 %v3038_v24  ;;  %v2909_v18 = vpack.c.bf16 %v1509_v33, %v1506_v45 }
 0x210   : > { %2910 = vmatpush1.bf16.msra.mxu0 %v2909_v18 }
 0x211   : > { %1138 = vmatmul.mubr.f32.gmra.mrb[34].mxu0 %v992_v61  ;;  %v1508_v61 = vld [vmem:[%s4401_s2 + $0x3d0] sm:$0xff]  ;;  %2912 = vmatprep.subr.bf16.mxu0 %v2911_v52 }
 0x212   : > { %1143 = vmatprep.mubr.f32.mxu0 %v3038_v24 }
 0x214   : > { %2914 = vmatpush1.bf16.msra.mxu0 %v2913_v56  ;;  %v3846_v56 = vld [vmem:[%s4402_s3 + $0x3] ss:$0 sm:$0xff] }
 0x215   : > { %1144 = vmatmul.mubr.f32.gmra.mrb[36].mxu0 %v993_v40  ;;  %v1511_v40 = vld [vmem:[%s4401_s2 + $0x440] sm:$0xff]  ;;  %2916 = vmatprep.subr.bf16.mxu0 %v2915_v5 }
 0x216   : > { %1149 = vmatprep.mubr.f32.mxu0 %v3038_v24 }
 0x218   : > { %2918 = vmatpush1.bf16.msra.mxu0 %v2917_v9 }
 0x219   : > { %1150 = vmatmul.mubr.f32.gmra.mrb[38].mxu0 %v994_v46  ;;  %v2939_v46 = vpack.c.bf16 %v1511_v40, %v1508_v61  ;;  %2920 = vmatprep.subr.bf16.mxu0 %v2919_v16 }
 0x21a   : > { %1594 = vmatprep.mubr.f32.mxu0 %v3038_v24 }
 0x21b   : > { %2940 = vmatprep.subr.bf16.mxu1 %v2939_v46 }
 0x21c   : > { %2942 = vmatpush3.bf16.msra.mxu1 %v2939_v46  ;;  %2922 = vmatpush1.bf16.msra.mxu0 %v2921_v27 }
 0x21d   : > { %2944 = vmatprep.subr.bf16.mxu1 %v2943_v58 }
 0x220   : > { %2946 = vmatpush3.bf16.msra.mxu1 %v2943_v58 }
 0x221   : > { %2948 = vmatprep.subr.bf16.mxu1 %v2947_v11 }
 0x224   : > { %2950 = vmatpush3.bf16.msra.mxu1 %v2947_v11 }
 0x225   : > { %2952 = vmatprep.subr.bf16.mxu1 %v2951_v32 }
 0x228   : > { %2954 = vmatpush3.bf16.msra.mxu1 %v2951_v32 }
 0x2d0   : > { %v3824_v30 = vpop.f32.mrb[24].mxu0 }
 0x2d1   : > { %v3826_v34 = vpop.f32.mrb[25].mxu0  ;;  %v2601_v35 = vpop.f32.mrb[16].mxu1  ;;  %v1261_v42 = vrot.slane %v3824_v30, 7 }
 0x2d2   : > { %v1294_v36 = vrot.slane %v2601_v35, 1  ;;  %v1222_v37 = vpop.f32.mrb[17].mxu1 }
 0x2d3   : > { %v1293_v39 = vrot.slane %v1222_v37, 1 }
 0x2d4   : > { %v1115_v41 = vpop.f32.mrb[26].mxu0 }
 0x2d5   : > { %v3831_v44 = vsel %vm949_vm0, %v1293_v39, %v1294_v36  ;;  %v1262_v29 = vrot.slane %v1115_v41, 7  ;;  %v1117_v23 = vpop.f32.mrb[27].mxu0  ;;  %v2604_v31 = vpop.f32.mrb[18].mxu1 }
 0x2d6   : > { %v1296_v45 = vrot.slane %v2604_v31, 1  ;;  %v1232_v33 = vpop.f32.mrb[19].mxu1 }
 0x2d7   : > { %v1275_v61 = vsel %vm916_vm1, %v1261_v42, %v1262_v29  ;;  %v1295_v18 = vrot.slane %v1232_v33, 1 }
 0x2d8   : > { %v1286_v40 = vadd.f32 %v1275_v61, %v1117_v23  ;;  %v1121_v46 = vpop.f32.mrb[28].mxu0 }
 0x2d9   : > { %v1306_v47 = vsel %vm949_vm0, %v1294_v36, %v1295_v18  ;;  %v1263_v49 = vrot.slane %v1121_v46, 7  ;;  %v1123_v52 = vpop.f32.mrb[29].mxu0  ;;  %v1305_v53 = vsel %vm949_vm0, %v1295_v18, %v1296_v45  ;;  %v2607_v54 = vpop.f32.mrb[20].mxu1 }
 0x2da   : > { %v1310_v55 = vsel %vm3582_vm2, 0.0, %v1306_v47  ;;  %v1298_v57 = vrot.slane %v2607_v54, 1  ;;  %v1242_v58 = vpop.f32.mrb[21].mxu1 }
 0x2db   : > { %v1318_v3 = vadd.f32 %v1310_v55, %v1286_v40  ;;  %v1274_v4 = vsel %vm916_vm1, %v1262_v29, %v1263_v49  ;;  %v1297_v5 = vrot.slane %v1242_v58, 1 }
 0x2dc   : > { %v1279_v6 = vsel %vm3594_vm3, 0.0, %v1274_v4  ;;  %v1127_v7 = vpop.f32.mrb[30].mxu0 }
 0x2dd   : > { %v1331_v8 = vadd.f32 %v3846_v56, %v1318_v3  ;;  %v1287_v9 = vadd.f32 %v1279_v6, %v1123_v52  ;;  %v1264_v10 = vrot.slane %v1127_v7, 7  ;;  %v1129_v11 = vpop.f32.mrb[31].mxu0  ;;  %v1304_v12 = vsel %vm949_vm0, %v1296_v45, %v1297_v5  ;;  %v2610_v14 = vpop.f32.mrb[22].mxu1 }
 0x2de   : > { %v1300_v16 = vrot.slane %v2610_v14, 1  ;;  %v1252_v17 = vpop.f32.mrb[23].mxu1  ;;  %v1303_v19 = vsel %vm949_vm0, %v1297_v5, %v1298_v57  ;;  %v1312_v36 = vsel %vm3604_vm4, 0.0, %v1304_v12 }
 0x2df   : > { %v3864_v26 = vadd.f32 %v1331_v8, %v3353_v38  ;;  %v1319_v27 = vadd.f32 %v1305_v53, %v1287_v9  ;;  %v1273_v22 = vsel %vm916_vm1, %v1263_v49, %v1264_v10  ;;  %v1299_v32 = vrot.slane %v1252_v17, 1 }
 0x2e0   : > { %v1288_v35 = vadd.f32 %v1273_v22, %v1129_v11  ;;  %v1133_v37 = vpop.f32.mrb[32].mxu0  ;;  %v1308_v41 = vsel %vm949_vm0, %v1300_v16, %v1293_v39 }
 0x2e1   : > { %2185 = vst [vmem:[%s3859_s10 + $0x10] sm:$0xff] %v3864_v26  ;;  %v1332_v29 = vadd.f32 %v3846_v56, %v1319_v27  ;;  %v1265_v23 = vrot.slane %v1133_v37, 7  ;;  %v1135_v31 = vpop.f32.mrb[33].mxu0  ;;  %v1302_v45 = vsel %vm949_vm0, %v1298_v57, %v1299_v32  ;;  %v1301_v33 = vsel %vm949_vm0, %v1299_v32, %v1300_v16 }
 0x2e2   : > { %v1320_v61 = vadd.f32 %v1312_v36, %v1288_v35  ;;  %v1314_v5 = vsel %vm3630_vm6, 0.0, %v1302_v45  ;;  %v1316_v30 = vsel %vm3660_vm9, 0.0, %v1308_v41 }
 0x2e3   : > { %v1272_v18 = vsel %vm916_vm1, %v1264_v10, %v1265_v23  ;;  %v3882_v39 = vadd.f32 %v1332_v29, %v3375_v60 }
 0x2e4   : > { %v1333_v40 = vadd.f32 %v3846_v56, %v1320_v61  ;;  %v1281_v46 = vsel %vm3613_vm5, 0.0, %v1272_v18  ;;  %v1139_v47 = vpop.f32.mrb[34].mxu0 }
 0x2e5   : > { %v1289_v49 = vadd.f32 %v1281_v46, %v1135_v31  ;;  %v1266_v52 = vrot.slane %v1139_v47, 7  ;;  %v1141_v53 = vpop.f32.mrb[35].mxu0  ;;  %2186 = vst [vmem:[%s3859_s10 + $0x20] sm:$0xff] %v3882_v39  ;;  %v1475_v46 = vmax.f32 %v3864_v26, 0.0 }
 0x2e6   : > { %v1341_v54 = vadd.f32 %v1333_v40, %v3364_v48 }
 0x2e7   : > { %v1321_v55 = vadd.f32 %v1303_v19, %v1289_v49  ;;  %v1271_v57 = vsel %vm916_vm1, %v1265_v23, %v1266_v52 }
 0x2e8   : > { %v1290_v58 = vadd.f32 %v1271_v57, %v1141_v53  ;;  %v1145_v3 = vpop.f32.mrb[36].mxu0  ;;  %2187 = vst [vmem:[%s3859_s10 + $0x30] sm:$0xff] %v1341_v54  ;;  %v1477_v41 = vmax.f32 %v1341_v54, 0.0  ;;  %v1833_v54 = vld [vmem:[%s4401_s2 + $0x58] sm:$0xff]  ;;  %v1835_v57 = vld [vmem:[%s4401_s2 + $0x68] sm:$0xff] }
 0x2e9   : > { %v1334_v4 = vadd.f32 %v3846_v56, %v1321_v55  ;;  %v1267_v6 = vrot.slane %v1145_v3, 7  ;;  %v1147_v7 = vpop.f32.mrb[37].mxu0  ;;  %v1836_v55 = vld [vmem:[%s4401_s2 + $0xc8] sm:$0xff]  ;;  %v1838_v3 = vld [vmem:[%s4401_s2 + $0xd8] sm:$0xff] }
 0x2ea   : > { %v1322_v8 = vadd.f32 %v1314_v5, %v1290_v58  ;;  %v2957_v58 = vpack.c.bf16 %v1836_v55, %v1833_v54  ;;  %v1840_v5 = vld [vmem:[%s4401_s2 + $0x140] sm:$0xff]  ;;  %v1863_v54 = vld [vmem:[%s4401_s2 + $0x4b8] sm:$0xff]  ;;  %v1866_v55 = vld [vmem:[%s4401_s2 + $0x528] sm:$0xff] }
 0x2eb   : > { %v1270_v9 = vsel %vm916_vm1, %v1266_v52, %v1267_v6  ;;  %v1342_v10 = vadd.f32 %v1334_v4, %v3388_v0  ;;  %v1837_v52 = vld [vmem:[%s4401_s2 + $0xd0] sm:$0xff]  ;;  %v2987_v4 = vpack.c.bf16 %v1838_v3, %v1835_v57  ;;  %v1865_v57 = vld [vmem:[%s4401_s2 + $0x4c8] sm:$0xff]  ;;  %v1868_v3 = vld [vmem:[%s4401_s2 + $0x538] sm:$0xff] }
 0x2ec   : > { %v1335_v11 = vadd.f32 %v3846_v56, %v1322_v8  ;;  %v1283_v12 = vsel %vm3639_vm7, 0.0, %v1270_v9  ;;  %v1151_v14 = vpop.f32.mrb[38].mxu0  ;;  %v1839_v8 = vld [vmem:[%s4401_s2 + $0x138] sm:$0xff]  ;;  %v1842_v9 = vld [vmem:[%s4401_s2 + $0x1a8] sm:$0xff] }
 0x2ed   : > { %v1291_v16 = vadd.f32 %v1283_v12, %v1147_v7  ;;  %v1268_v17 = vrot.slane %v1151_v14, 7  ;;  %v1153_v19 = vpop.f32.mrb[39].mxu0  ;;  %2188 = vst [vmem:[%s3859_s10 + $0x40] sm:$0xff] %v1342_v10  ;;  %2988 = vmatprep.subr.bf16.mxu1 %v2987_v4  ;;  %v1844_v12 = vld [vmem:[%s4401_s2 + $0x1b8] sm:$0xff] }
 0x2ee   : > { %v1343_v27 = vadd.f32 %v1335_v11, %v3383_v63  ;;  %v2961_v11 = vpack.c.bf16 %v1842_v9, %v1839_v8  ;;  %v1869_v8 = vld [vmem:[%s4401_s2 + $0x598] sm:$0xff]  ;;  %v1872_v9 = vld [vmem:[%s4401_s2 + $0x608] sm:$0xff] }
 0x2ef   : > { %v1323_v22 = vadd.f32 %v1301_v33, %v1291_v16  ;;  %v1276_v32 = vsel %vm916_vm1, %v1268_v17, %v1261_v42  ;;  %v1269_v35 = vsel %vm916_vm1, %v1267_v6, %v1268_v17  ;;  %v1843_v6 = vld [vmem:[%s4401_s2 + $0x1b0] sm:$0xff]  ;;  %v1846_v16 = vld [vmem:[%s4401_s2 + $0x220] sm:$0xff] }
 0x2f0   : > { %v1277_v36 = vsel %vm3648_vm8, 0.0, %v1276_v32  ;;  %v1292_v37 = vadd.f32 %v1269_v35, %v1153_v19  ;;  %2189 = vst [vmem:[%s3859_s10 + $0x50] sm:$0xff] %v1343_v27  ;;  %v1479_v47 = vmax.f32 %v1343_v27, 0.0  ;;  %v2959_v7 = vpack.c.bf16 %v1843_v6, %v1840_v5  ;;  %v1849_v17 = vld [vmem:[%s4401_s2 + $0x290] sm:$0xff]  ;;  %v1845_v27 = vld [vmem:[%s4401_s2 + $0x218] sm:$0xff]  ;;  %v1847_v32 = vld [vmem:[%s4401_s2 + $0x228] sm:$0xff] }
 0x2f1   : > { %v1336_v29 = vadd.f32 %v3846_v56, %v1323_v22  ;;  %v1285_v23 = vadd.f32 %v1277_v36, %v3826_v34  ;;  %v2963_v19 = vpack.c.bf16 %v1849_v17, %v1846_v16  ;;  %v1848_v22 = vld [vmem:[%s4401_s2 + $0x288] sm:$0xff]  ;;  %v1850_v36 = vld [vmem:[%s4401_s2 + $0x298] sm:$0xff]  ;;  %v1870_v5 = vld [vmem:[%s4401_s2 + $0x5a0] sm:$0xff] }
 0x2f2   : > { %v1324_v31 = vadd.f32 %v1316_v30, %v1292_v37  ;;  %v2965_v35 = vpack.c.bf16 %v1848_v22, %v1845_v27  ;;  %v2995_v37 = vpack.c.bf16 %v1850_v36, %v1847_v32  ;;  %v1873_v6 = vld [vmem:[%s4401_s2 + $0x610] sm:$0xff]  ;;  %v1876_v16 = vld [vmem:[%s4401_s2 + $0x680] sm:$0xff]  ;;  %v1875_v27 = vld [vmem:[%s4401_s2 + $0x678] sm:$0xff] }
 0x2f3   : > { %v1317_v42 = vadd.f32 %v3831_v44, %v1285_v23  ;;  %v1344_v45 = vadd.f32 %v1336_v29, %v3404_v2  ;;  %v1476_v44 = vmax.f32 %v3882_v39, 0.0  ;;  %v1834_v39 = vld [vmem:[%s4401_s2 + $0x60] sm:$0xff]  ;;  %v1855_v23 = vld [vmem:[%s4401_s2 + $0x370] sm:$0xff]  ;;  %v1878_v22 = vld [vmem:[%s4401_s2 + $0x6e8] sm:$0xff] }
 0x2f4   : > { %v1337_v33 = vadd.f32 %v3846_v56, %v1324_v31  ;;  %v2955_v53 = vpack.c.bf16 %v1837_v52, %v1834_v39  ;;  %v1852_v29 = vld [vmem:[%s4401_s2 + $0x300] sm:$0xff]  ;;  %v1851_v31 = vld [vmem:[%s4401_s2 + $0x2f8] sm:$0xff]  ;;  %v1867_v52 = vld [vmem:[%s4401_s2 + $0x530] sm:$0xff] }
 0x2f5   : > { %v1330_v61 = vadd.f32 %v3846_v56, %v1317_v42  ;;  %2190 = vst [vmem:[%s3859_s10 + $0x60] sm:$0xff] %v1344_v45  ;;  %v1478_v56 = vmax.f32 %v1342_v10, 0.0  ;;  %v1480_v49 = vmax.f32 %v1344_v45, 0.0  ;;  %v1841_v10 = vld [vmem:[%s4401_s2 + $0x148] sm:$0xff]  ;;  %v2967_v30 = vpack.c.bf16 %v1855_v23, %v1852_v29  ;;  %v1864_v39 = vld [vmem:[%s4401_s2 + $0x4c0] sm:$0xff]  ;;  %v1879_v17 = vld [vmem:[%s4401_s2 + $0x6f0] sm:$0xff] }
 0x2f6   : > { %v1345_v18 = vadd.f32 %v1337_v33, %v3399_v1  ;;  %2956 = vmatprep.subr.bf16.mxu0 %v2955_v53  ;;  %v2991_v14 = vpack.c.bf16 %v1844_v12, %v1841_v10  ;;  %v1854_v42 = vld [vmem:[%s4401_s2 + $0x368] sm:$0xff]  ;;  %v2975_v53 = vpack.c.bf16 %v1867_v52, %v1864_v39  ;;  %v1874_v12 = vld [vmem:[%s4401_s2 + $0x618] sm:$0xff] }
 0x2f7   : > { %v1338_v40 = vadd.f32 %v1330_v61, %v3359_v43  ;;  %v1853_v45 = vld [vmem:[%s4401_s2 + $0x308] sm:$0xff]  ;;  %v2969_v33 = vpack.c.bf16 %v1854_v42, %v1851_v31  ;;  %v1856_v61 = vld [vmem:[%s4401_s2 + $0x378] sm:$0xff] }
 0x2f8   : > { %2191 = vst [vmem:[%s3859_s10 + $0x70] sm:$0xff] %v1345_v18  ;;  %v1481_v26 = vmax.f32 %v1345_v18, 0.0  ;;  %v2999_v18 = vpack.c.bf16 %v1856_v61, %v1853_v45  ;;  %v1871_v10 = vld [vmem:[%s4401_s2 + $0x5a8] sm:$0xff]  ;;  %v1880_v36 = vld [vmem:[%s4401_s2 + $0x6f8] sm:$0xff] }
 0x2f9   : > { %2184 = vst [vmem:[%s3859_s10] sm:$0xff] %v1338_v40  ;;  %v1474_v34 = vmax.f32 %v1338_v40, 0.0  ;;  %v1858_v40 = vld [vmem:[%s4401_s2 + $0x3e0] sm:$0xff]  ;;  %v1877_v32 = vld [vmem:[%s4401_s2 + $0x688] sm:$0xff] }
 0x2fb   : > { %1595 = vmatmul.mubr.f32.vlgmr.msra.gmra.mrb[40].mxu0 %v1474_v34  ;;  %2643 = vmatprep.mubr.f32.mxu1 %v1474_v34  ;;  %v1861_v34 = vld [vmem:[%s4401_s2 + $0x450] sm:$0xff] }
 0x2fc   : > { %2644 = vmatmul.mubr.f32.vlgmr.msra.gmra.mrb[24].mxu1 %v1475_v46  ;;  %1600 = vmatprep.mubr.f32.mxu0 %v3038_v24 }
 0x2fd   : > { %2646 = vmatprep.mubr.f32.mxu1 %v1476_v44  ;;  %2958 = vmatpush1.bf16.msra.mxu0 %v2957_v58  ;;  %v2977_v58 = vpack.c.bf16 %v1866_v55, %v1863_v54 }
 0x2fe   : > { %2990 = vmatpush3.bf16.msra.mxu1 %v2987_v4  ;;  %2960 = vmatprep.subr.bf16.mxu0 %v2959_v7  ;;  %v3007_v4 = vpack.c.bf16 %v1868_v3, %v1865_v57  ;;  %v2979_v7 = vpack.c.bf16 %v1873_v6, %v1870_v5 }
 0x2ff   : > { %1601 = vmatmul.mubr.f32.gmra.mrb[42].mxu0 %v1475_v46  ;;  %2992 = vmatprep.subr.bf16.mxu1 %v2991_v14  ;;  %v2971_v46 = vpack.c.bf16 %v1861_v34, %v1858_v40 }
 0x300   : > { %2647 = vmatmul.mubr.f32.gmra.mrb[26].mxu1 %v1477_v41  ;;  %1606 = vmatprep.mubr.f32.mxu0 %v3038_v24 }
 0x301   : > { %2649 = vmatprep.mubr.f32.mxu1 %v1478_v56  ;;  %2962 = vmatpush1.bf16.msra.mxu0 %v2961_v11  ;;  %v2981_v11 = vpack.c.bf16 %v1872_v9, %v1869_v8 }
 0x302   : > { %2994 = vmatpush3.bf16.msra.mxu1 %v2991_v14  ;;  %2964 = vmatprep.subr.bf16.mxu0 %v2963_v19  ;;  %v3011_v14 = vpack.c.bf16 %v1874_v12, %v1871_v10  ;;  %v2983_v19 = vpack.c.bf16 %v1879_v17, %v1876_v16 }
 0x303   : > { %1607 = vmatmul.mubr.f32.gmra.mrb[44].mxu0 %v1476_v44  ;;  %2996 = vmatprep.subr.bf16.mxu1 %v2995_v37  ;;  %v1857_v44 = vld [vmem:[%s4401_s2 + $0x3d8] sm:$0xff] }
 0x304   : > { %2650 = vmatmul.mubr.f32.gmra.mrb[28].mxu1 %v1479_v47  ;;  %1612 = vmatprep.mubr.f32.mxu0 %v3038_v24 }
 0x305   : > { %2652 = vmatprep.mubr.f32.mxu1 %v1480_v49  ;;  %2966 = vmatpush1.bf16.msra.mxu0 %v2965_v35  ;;  %v2985_v35 = vpack.c.bf16 %v1878_v22, %v1875_v27 }
 0x306   : > { %2998 = vmatpush3.bf16.msra.mxu1 %v2995_v37  ;;  %2968 = vmatprep.subr.bf16.mxu0 %v2967_v30  ;;  %v3015_v37 = vpack.c.bf16 %v1880_v36, %v1877_v32 }
 0x307   : > { %1613 = vmatmul.mubr.f32.gmra.mrb[46].mxu0 %v1477_v41  ;;  %3000 = vmatprep.subr.bf16.mxu1 %v2999_v18  ;;  %v1860_v41 = vld [vmem:[%s4401_s2 + $0x448] sm:$0xff] }
 0x308   : > { %2653 = vmatmul.mubr.f32.gmra.mrb[30].mxu1 %v1481_v26  ;;  %1618 = vmatprep.mubr.f32.mxu0 %v3038_v24 }
 0x309   : > { %2970 = vmatpush1.bf16.msra.mxu0 %v2969_v33 }
 0x30a   : > { %3002 = vmatpush3.bf16.msra.mxu1 %v2999_v18  ;;  %2972 = vmatprep.subr.bf16.mxu0 %v2971_v46 }
 0x30b   : > { %1619 = vmatmul.mubr.f32.gmra.mrb[48].mxu0 %v1478_v56  ;;  %v1859_v56 = vld [vmem:[%s4401_s2 + $0x3e8] sm:$0xff] }
 0x30c   : > { %1624 = vmatprep.mubr.f32.mxu0 %v3038_v24 }
 0x30f   : > { %1625 = vmatmul.mubr.f32.gmra.mrb[50].mxu0 %v1479_v47  ;;  %v2973_v47 = vpack.c.bf16 %v1860_v41, %v1857_v44 }
 0x310   : > { %1630 = vmatprep.mubr.f32.mxu0 %v3038_v24 }
 0x311   : > { %2974 = vmatpush1.bf16.msra.mxu0 %v2973_v47 }
 0x312   : > { %2976 = vmatprep.subr.bf16.mxu0 %v2975_v53 }
 0x313   : > { %1631 = vmatmul.mubr.f32.gmra.mrb[52].mxu0 %v1480_v49  ;;  %v1862_v49 = vld [vmem:[%s4401_s2 + $0x458] sm:$0xff] }
 0x314   : > { %1636 = vmatprep.mubr.f32.mxu0 %v3038_v24 }
 0x315   : > { %2978 = vmatpush1.bf16.msra.mxu0 %v2977_v58 }
 0x316   : > { %2980 = vmatprep.subr.bf16.mxu0 %v2979_v7 }
 0x317   : > { %1637 = vmatmul.mubr.f32.gmra.mrb[54].mxu0 %v1481_v26  ;;  %v3003_v26 = vpack.c.bf16 %v1862_v49, %v1859_v56 }
 0x318   : > { %1945 = vmatprep.mubr.f32.mxu0 %v3038_v24 }
 0x319   : > { %3004 = vmatprep.subr.bf16.mxu1 %v3003_v26  ;;  %2982 = vmatpush1.bf16.msra.mxu0 %v2981_v11 }
 0x31a   : > { %3006 = vmatpush3.bf16.msra.mxu1 %v3003_v26  ;;  %2984 = vmatprep.subr.bf16.mxu0 %v2983_v19 }
 0x31b   : > { %3008 = vmatprep.subr.bf16.mxu1 %v3007_v4 }
 0x31d   : > { %2986 = vmatpush1.bf16.msra.mxu0 %v2985_v35 }
 0x31e   : > { %3010 = vmatpush3.bf16.msra.mxu1 %v3007_v4 }
 0x31f   : > { %3012 = vmatprep.subr.bf16.mxu1 %v3011_v14 }
 0x322   : > { %3014 = vmatpush3.bf16.msra.mxu1 %v3011_v14 }
 0x323   : > { %3016 = vmatprep.subr.bf16.mxu1 %v3015_v37 }
 0x326   : > { %3018 = vmatpush3.bf16.msra.mxu1 %v3015_v37 }
 0x3ce   : > { %v4080_v29 = vpop.f32.mrb[40].mxu0 }
 0x3cf   : > { %v4082_v23 = vpop.f32.mrb[41].mxu0  ;;  %v2645_v30 = vpop.f32.mrb[24].mxu1  ;;  %v1748_v61 = vrot.slane %v4080_v29, 7 }
 0x3d0   : > { %v1781_v31 = vrot.slane %v2645_v30, 1  ;;  %v1709_v42 = vpop.f32.mrb[25].mxu1 }
 0x3d1   : > { %v1780_v45 = vrot.slane %v1709_v42, 1 }
 0x3d2   : > { %v1602_v33 = vpop.f32.mrb[42].mxu0 }
 0x3d3   : > { %v4087_v18 = vsel %vm949_vm0, %v1780_v45, %v1781_v31  ;;  %v1749_v40 = vrot.slane %v1602_v33, 7  ;;  %v1604_v34 = vpop.f32.mrb[43].mxu0  ;;  %v2648_v46 = vpop.f32.mrb[26].mxu1 }
 0x3d4   : > { %v1783_v44 = vrot.slane %v2648_v46, 1  ;;  %v1719_v41 = vpop.f32.mrb[27].mxu1 }
 0x3d5   : > { %v1762_v56 = vsel %vm916_vm1, %v1748_v61, %v1749_v40  ;;  %v1782_v47 = vrot.slane %v1719_v41, 1 }
 0x3d6   : > { %v1773_v49 = vadd.f32 %v1762_v56, %v1604_v34  ;;  %v1608_v26 = vpop.f32.mrb[44].mxu0 }
 0x3d7   : > { %v1793_v39 = vsel %vm949_vm0, %v1781_v31, %v1782_v47  ;;  %v1750_v52 = vrot.slane %v1608_v26, 7  ;;  %v1610_v53 = vpop.f32.mrb[45].mxu0  ;;  %v1792_v54 = vsel %vm949_vm0, %v1782_v47, %v1783_v44  ;;  %v2651_v55 = vpop.f32.mrb[28].mxu1 }
 0x3d8   : > { %v1797_v57 = vsel %vm3582_vm2, 0.0, %v1793_v39  ;;  %v1785_v58 = vrot.slane %v2651_v55, 1  ;;  %v1729_v3 = vpop.f32.mrb[29].mxu1 }
 0x3d9   : > { %v1805_v4 = vadd.f32 %v1797_v57, %v1773_v49  ;;  %v1761_v5 = vsel %vm916_vm1, %v1749_v40, %v1750_v52  ;;  %v1784_v6 = vrot.slane %v1729_v3, 1 }
 0x3da   : > { %v1766_v7 = vsel %vm3594_vm3, 0.0, %v1761_v5  ;;  %v1614_v8 = vpop.f32.mrb[46].mxu0 }
 0x3db   : > { %v1774_v9 = vadd.f32 %v1766_v7, %v1610_v53  ;;  %v1751_v10 = vrot.slane %v1614_v8, 7  ;;  %v1616_v11 = vpop.f32.mrb[47].mxu0  ;;  %v1791_v12 = vsel %vm949_vm0, %v1783_v44, %v1784_v6  ;;  %v2654_v14 = vpop.f32.mrb[30].mxu1  ;;  %v1790_v19 = vsel %vm949_vm0, %v1784_v6, %v1785_v58 }
 0x3dc   : > { %v1787_v16 = vrot.slane %v2654_v14, 1  ;;  %v1739_v17 = vpop.f32.mrb[31].mxu1  ;;  %v1799_v30 = vsel %vm3604_vm4, 0.0, %v1791_v12 }
 0x3dd   : > { %v1806_v27 = vadd.f32 %v1792_v54, %v1774_v9  ;;  %v1760_v22 = vsel %vm916_vm1, %v1750_v52, %v1751_v10  ;;  %v1786_v32 = vrot.slane %v1739_v17, 1 }
 0x3de   : > { %v1775_v35 = vadd.f32 %v1760_v22, %v1616_v11  ;;  %v1620_v36 = vpop.f32.mrb[48].mxu0  ;;  %v1795_v37 = vsel %vm949_vm0, %v1787_v16, %v1780_v45 }
 0x3df   : > { %v1752_v31 = vrot.slane %v1620_v36, 7  ;;  %v1622_v42 = vpop.f32.mrb[49].mxu0  ;;  %v1789_v33 = vsel %vm949_vm0, %v1785_v58, %v1786_v32  ;;  %v1788_v40 = vsel %vm949_vm0, %v1786_v32, %v1787_v16  ;;  %v2286_v16 = vld [vmem:[%s4402_s3 + $0x4] ss:$0 sm:$0xff] }
 0x3e0   : > { %v1807_v34 = vadd.f32 %v1799_v30, %v1775_v35  ;;  %v1801_v53 = vsel %vm3630_vm6, 0.0, %v1789_v33  ;;  %v1819_v35 = vadd.f32 %v2286_v16, %v1806_v27 }
 0x3e1   : > { %v1759_v46 = vsel %vm916_vm1, %v1751_v10, %v1752_v31 }
 0x3e2   : > { %v1768_v44 = vsel %vm3613_vm5, 0.0, %v1759_v46  ;;  %v1626_v41 = vpop.f32.mrb[50].mxu0 }
 0x3e3   : > { %v1776_v45 = vadd.f32 %v1768_v44, %v1622_v42  ;;  %v1753_v56 = vrot.slane %v1626_v41, 7  ;;  %v1628_v47 = vpop.f32.mrb[51].mxu0  ;;  %v1827_v42 = vmax.f32 %v1819_v35, 0.0  ;;  %v1349_v44 = vpop.permute.xlu0 %1348 }
 0x3e4   : > { %v1373_v41 = vpop.permute.xlu1 %1372 }
 0x3e5   : > { %v1808_v49 = vadd.f32 %v1790_v19, %v1776_v45  ;;  %v1758_v26 = vsel %vm916_vm1, %v1752_v31, %v1753_v56  ;;  %v1803_v19 = vsel %vm3660_vm9, 0.0, %v1795_v37  ;;  %v1820_v31 = vadd.f32 %v2286_v16, %v1807_v34 }
 0x3e6   : > { %v1777_v39 = vadd.f32 %v1758_v26, %v1628_v47  ;;  %v1632_v52 = vpop.f32.mrb[52].mxu0 }
 0x3e7   : > { %v1754_v54 = vrot.slane %v1632_v52, 7  ;;  %v1634_v55 = vpop.f32.mrb[53].mxu0  ;;  %v1821_v33 = vadd.f32 %v2286_v16, %v1808_v49  ;;  %v1347_v45 = vpop.permute.xlu0 %1346  ;;  %v4152_v49 = vand.u32 127, %v225_v20 }
 0x3e8   : > { %v1809_v57 = vadd.f32 %v1801_v53, %v1777_v39 }
 0x3e9   : > { %v1757_v58 = vsel %vm916_vm1, %v1753_v56, %v1754_v54  ;;  %v1829_v37 = vmax.f32 %v1821_v33, 0.0  ;;  %v1353_v56 = vpop.permute.xlu1 %1352  ;;  %vm348_vm10 = vcmp.lt.s32.totalorder %v4152_v49, 8  ;;  %vm349_vm11 = vcmp.ge.s32.totalorder %v4152_v49, 120 }
 0x3ea   : > { %v1770_v3 = vsel %vm3639_vm7, 0.0, %v1757_v58  ;;  %v1638_v5 = vpop.f32.mrb[54].mxu0  ;;  %v1387_v53 = vsel %vm348_vm10, -inf, %v1373_v41  ;;  %v1362_v58 = vsel %vm349_vm11, -inf, %v1347_v45 }
 0x3eb   : > { %v1778_v6 = vadd.f32 %v1770_v3, %v1634_v55  ;;  %v1755_v7 = vrot.slane %v1638_v5, 7  ;;  %v1640_v8 = vpop.f32.mrb[55].mxu0  ;;  %v1371_v47 = vpop.permute.xlu0 %1370 }
 0x3ec   : > { %v1386_v3 = vsel %vm348_vm10, -inf, %v1371_v47 }
 0x3ed   : > { %v1810_v9 = vadd.f32 %v1788_v40, %v1778_v6  ;;  %v1763_v10 = vsel %vm916_vm1, %v1755_v7, %v1748_v61  ;;  %v1756_v11 = vsel %vm916_vm1, %v1754_v54, %v1755_v7  ;;  %v1818_v61 = vadd.f32 %v2286_v16, %v1805_v4  ;;  %v1377_v26 = vpop.permute.xlu1 %1376 }
 0x3ee   : > { %v1764_v12 = vsel %vm3648_vm8, 0.0, %v1763_v10  ;;  %v1779_v14 = vadd.f32 %v1756_v11, %v1640_v8  ;;  %v1822_v40 = vadd.f32 %v2286_v16, %v1809_v57  ;;  %v1365_v6 = vsel %vm349_vm11, -inf, %v1353_v56 }
 0x3ef   : > { %v1772_v17 = vadd.f32 %v1764_v12, %v4082_v23  ;;  %v1826_v30 = vmax.f32 %v1818_v61, 0.0  ;;  %v1828_v23 = vmax.f32 %v1820_v31, 0.0  ;;  %v1823_v46 = vadd.f32 %v2286_v16, %v1810_v9  ;;  %v1375_v39 = vpop.permute.xlu0 %1374 }
 0x3f0   : > { %v1811_v29 = vadd.f32 %v1803_v19, %v1779_v14  ;;  %v1388_v20 = vsel %vm348_vm10, -inf, %v1375_v39  ;;  %v1389_v7 = vsel %vm348_vm10, -inf, %v1377_v26  ;;  %v1394_v8 = vmax.f32 %v1386_v3, %v1362_v58 }
 0x3f1   : > { %v1804_v22 = vadd.f32 %v4087_v18, %v1772_v17  ;;  %v1830_v18 = vmax.f32 %v1822_v40, 0.0  ;;  %v1831_v27 = vmax.f32 %v1823_v46, 0.0  ;;  %v1351_v52 = vpop.permute.xlu1 %1350  ;;  %v1397_v14 = vmax.f32 %v1389_v7, %v1365_v6 }
 0x3f2   : > { %v1824_v4 = vadd.f32 %v2286_v16, %v1811_v29  ;;  %v1364_v54 = vsel %vm349_vm11, -inf, %v1351_v52 }
 0x3f3   : > { %v1817_v32 = vadd.f32 %v2286_v16, %v1804_v22  ;;  %v1355_v55 = vpop.permute.xlu0 %1354  ;;  %v1396_v5 = vmax.f32 %v1388_v20, %v1364_v54  ;;  %v4179_v16 = vmax.f32 %v3359_v43, %v1394_v8  ;;  %v4188_v61 = vmax.f32 %v3364_v48, %v1397_v14 }
 0x3f4   : > { %v1832_v34 = vmax.f32 %v1824_v4, 0.0  ;;  %v1366_v29 = vsel %vm349_vm11, -inf, %v1355_v55 }
 0x3f5   : > { %v1825_v36 = vmax.f32 %v1817_v32, 0.0  ;;  %v1357_v9 = vpop.permute.xlu1 %1356  ;;  %v4176_v11 = vmax.f32 %v3375_v60, %v1396_v5  ;;  %v1434_v35 = vrot.slane %v4179_v16, 7  ;;  %v1413_v33 = vrot.slane %v4188_v61, 1 }
 0x3f6   : > { %v1367_v60 = vsel %vm349_vm11, -inf, %v1357_v9 }
 0x3f7   : > { %1946 = vmatmul.mubr.f32.vlgmr.msra.gmra.mrb[56].mxu0 %v1825_v36  ;;  %2687 = vmatprep.mubr.f32.mxu1 %v1825_v36  ;;  %v1379_v12 = vpop.permute.xlu0 %1378  ;;  %v1412_v19 = vrot.slane %v4176_v11, 1  ;;  %v1436_v36 = vrot.slane %v4176_v11, 7 }
 0x3f8   : > { %2688 = vmatmul.mubr.f32.vlgmr.msra.gmra.mrb[32].mxu1 %v1826_v30  ;;  %1951 = vmatprep.mubr.f32.mxu0 %v3038_v24  ;;  %v1390_v22 = vsel %vm348_vm10, -inf, %v1379_v12 }
 0x3f9   : > { %2690 = vmatprep.mubr.f32.mxu1 %v1827_v42  ;;  %v1422_v39 = vsel %vm949_vm0, %v1412_v19, %v1413_v33 }
 0x3fb   : > { %1952 = vmatmul.mubr.f32.gmra.mrb[58].mxu0 %v1826_v30  ;;  %v1398_v30 = vmax.f32 %v1390_v22, %v1366_v29  ;;  %v1359_v31 = vpop.permute.xlu0 %1358 }
 0x3fc   : > { %2691 = vmatmul.mubr.f32.gmra.mrb[34].mxu1 %v1828_v23  ;;  %1957 = vmatprep.mubr.f32.mxu0 %v3038_v24 }
 0x3fd   : > { %2693 = vmatprep.mubr.f32.mxu1 %v1829_v37  ;;  %v4208_v46 = vmax.f32 %v3388_v0, %v1398_v30 }
 0x3ff   : > { %1958 = vmatmul.mubr.f32.gmra.mrb[60].mxu0 %v1827_v42  ;;  %v1383_v45 = vpop.permute.xlu0 %1382 }
 0x400   : > { %2694 = vmatmul.mubr.f32.gmra.mrb[36].mxu1 %v1830_v18  ;;  %1963 = vmatprep.mubr.f32.mxu0 %v3038_v24  ;;  %v1392_v55 = vsel %vm348_vm10, -inf, %v1383_v45 }
 0x401   : > { %2696 = vmatprep.mubr.f32.mxu1 %v1831_v27 }
 0x403   : > { %1964 = vmatmul.mubr.f32.gmra.mrb[62].mxu0 %v1828_v23  ;;  %v1437_v23 = vrot.slane %v4188_v61, 7 }
 0x404   : > { %2697 = vmatmul.mubr.f32.gmra.mrb[38].mxu1 %v1832_v34  ;;  %1969 = vmatprep.mubr.f32.mxu0 %v3038_v24 }
 0x405   : > { %v1446_v20 = vsel %vm916_vm1, %v1436_v36, %v1437_v23 }
 0x407   : > { %1970 = vmatmul.mubr.f32.gmra.mrb[64].mxu0 %v1829_v37 }
 0x408   : > { %1975 = vmatprep.mubr.f32.mxu0 %v3038_v24 }
 0x40b   : > { %1976 = vmatmul.mubr.f32.gmra.mrb[66].mxu0 %v1830_v18 }
 0x40c   : > { %1981 = vmatprep.mubr.f32.mxu0 %v3038_v24 }
 0x40f   : > { %1982 = vmatmul.mubr.f32.gmra.mrb[68].mxu0 %v1831_v27 }
 0x410   : > { %1987 = vmatprep.mubr.f32.mxu0 %v3038_v24  ;;  %v1363_v24 = vsel %vm349_vm11, -inf, %v1349_v44 }
 0x411   : > { %v1395_v57 = vmax.f32 %v1387_v53, %v1363_v24  ;;  %v1414_v53 = vrot.slane %v4208_v46, 1  ;;  %v1438_v24 = vrot.slane %v4208_v46, 7 }
 0x413   : > { %1988 = vmatmul.mubr.f32.gmra.mrb[70].mxu0 %v1832_v34  ;;  %v4173_v10 = vmax.f32 %v3353_v38, %v1395_v57  ;;  %v1381_v38 = vpop.permute.xlu1 %1380  ;;  %v1421_v30 = vsel %vm949_vm0, %v1413_v33, %v1414_v53 }
 0x414   : > { %v1391_v43 = vsel %vm348_vm10, -inf, %v1381_v38 }
 0x415   : > { %v1411_v17 = vrot.slane %v4173_v10, 1  ;;  %v1435_v32 = vrot.slane %v4173_v10, 7  ;;  %v1399_v42 = vmax.f32 %v1391_v43, %v1367_v60 }
 0x417   : > { %v1423_v48 = vsel %vm949_vm0, %v1411_v17, %v1412_v19  ;;  %v1448_v40 = vsel %vm916_vm1, %v1434_v35, %v1435_v32  ;;  %v1361_v37 = vpop.permute.xlu1 %1360  ;;  %v1447_v27 = vsel %vm916_vm1, %v1435_v32, %v1436_v36  ;;  %v4219_v41 = vmax.f32 %v3383_v63, %v1399_v42 }
 0x418   : > { %v1427_v4 = vsel %vm3582_vm2, -inf, %v1423_v48  ;;  %v1452_v52 = vsel %vm3594_vm3, -inf, %v1447_v27  ;;  %v1368_v63 = vsel %vm349_vm11, -inf, %v1359_v31  ;;  %v1369_v8 = vsel %vm349_vm11, -inf, %v1361_v37 }
 0x419   : > { %v1459_v26 = vmax.f32 %v1448_v40, %v1427_v4  ;;  %v1415_v7 = vrot.slane %v4219_v41, 1  ;;  %v1460_v19 = vmax.f32 %v1452_v52, %v1422_v39  ;;  %v1439_v29 = vrot.slane %v4219_v41, 7 }
 0x41a   : > { %v1400_v43 = vmax.f32 %v1392_v55, %v1368_v63  ;;  %v1445_v31 = vsel %vm916_vm1, %v1437_v23, %v1438_v24  ;;  %v1429_v52 = vsel %vm3604_vm4, -inf, %v1421_v30 }
 0x41b   : > { %v1385_v9 = vpop.permute.xlu1 %1384  ;;  %v1467_v38 = vmax.f32 %v4173_v10, %v1459_v26  ;;  %v1468_v49 = vmax.f32 %v4176_v11, %v1460_v19  ;;  %v1461_v19 = vmax.f32 %v1446_v20, %v1429_v52 }
 0x41c   : > { %v1393_v48 = vsel %vm348_vm10, -inf, %v1385_v9 }
 0x41d   : > { %v1401_v63 = vmax.f32 %v1393_v48, %v1369_v8 }
 0x4ca   : > { %v4210_v18 = vpop.f32.mrb[56].mxu0 }
 0x4cb   : > { %v4216_v34 = vpop.f32.mrb[57].mxu0  ;;  %v2689_v44 = vpop.f32.mrb[32].mxu1  ;;  %v2099_v57 = vrot.slane %v4210_v18, 7 }
 0x4cc   : > { %v2132_v56 = vrot.slane %v2689_v44, 1  ;;  %v4221_v47 = vpop.f32.mrb[33].mxu1  ;;  %v4269_v44 = vld [vmem:[%s4402_s3 + $0x5] ss:$0 sm:$0xff] }
 0x4cd   : > { %v2131_v0 = vrot.slane %v4221_v47, 1 }
 0x4ce   : > { %v1953_v54 = vpop.f32.mrb[58].mxu0 }
 0x4cf   : > { %v4241_v58 = vsel %vm949_vm0, %v2131_v0, %v2132_v56  ;;  %v2100_v3 = vrot.slane %v1953_v54, 7  ;;  %v1955_v5 = vpop.f32.mrb[59].mxu0  ;;  %v2692_v6 = vpop.f32.mrb[34].mxu1  ;;  %v4281_v54 = vmax.f32 %v3404_v2, %v1400_v43 }
 0x4d0   : > { %v2134_v12 = vrot.slane %v2692_v6, 1  ;;  %v2070_v14 = vpop.f32.mrb[35].mxu1 }
 0x4d1   : > { %v2113_v22 = vsel %vm916_vm1, %v2099_v57, %v2100_v3  ;;  %v2133_v60 = vrot.slane %v2070_v14, 1  ;;  %v1416_v2 = vrot.slane %v4281_v54, 1 }
 0x4d2   : > { %v2124_v32 = vadd.f32 %v2113_v22, %v1955_v5  ;;  %v1959_v36 = vpop.f32.mrb[60].mxu0  ;;  %v1454_v5 = vsel %vm3613_vm5, -inf, %v1445_v31  ;;  %v4296_v31 = vmax.f32 %v3399_v1, %v1401_v63 }
 0x4d3   : > { %v2144_v42 = vsel %vm949_vm0, %v2132_v56, %v2133_v60  ;;  %v2101_v40 = vrot.slane %v1959_v36, 7  ;;  %v1961_v37 = vpop.f32.mrb[61].mxu0  ;;  %v2143_v4 = vsel %vm949_vm0, %v2133_v60, %v2134_v12  ;;  %v2695_v27 = vpop.f32.mrb[36].mxu1  ;;  %v1420_v56 = vsel %vm949_vm0, %v1414_v53, %v1415_v7 }
 0x4d4   : > { %v2148_v33 = vsel %vm3582_vm2, 0.0, %v2144_v42  ;;  %v2136_v23 = vrot.slane %v2695_v27, 1  ;;  %v2080_v45 = vpop.f32.mrb[37].mxu1  ;;  %v1419_v47 = vsel %vm949_vm0, %v1415_v7, %v1416_v2  ;;  %v1469_v27 = vmax.f32 %v4188_v61, %v1461_v19 }
 0x4d5   : > { %v2156_v26 = vadd.f32 %v2148_v33, %v2124_v32  ;;  %v2112_v39 = vsel %vm916_vm1, %v2100_v3, %v2101_v40  ;;  %v2135_v50 = vrot.slane %v2080_v45, 1  ;;  %v1462_v33 = vmax.f32 %v1454_v5, %v1420_v56 }
 0x4d6   : > { %v2117_v11 = vsel %vm3594_vm3, 0.0, %v2112_v39  ;;  %v1965_v55 = vpop.f32.mrb[62].mxu0  ;;  %v1431_v61 = vsel %vm3630_vm6, -inf, %v1419_v47  ;;  %v1444_v56 = vsel %vm916_vm1, %v1438_v24, %v1439_v29  ;;  %v1410_v5 = vrot.slane %v4179_v16, 1 }
 0x4d7   : > { %v2169_v53 = vadd.f32 %v4269_v44, %v2156_v26  ;;  %v2125_v6 = vadd.f32 %v2117_v11, %v1961_v37  ;;  %v2102_v9 = vrot.slane %v1965_v55, 7  ;;  %v1967_v3 = vpop.f32.mrb[63].mxu0  ;;  %v2142_v14 = vsel %vm949_vm0, %v2134_v12, %v2135_v50  ;;  %v2698_v8 = vpop.f32.mrb[38].mxu1 }
 0x4d8   : > { %v2138_v22 = vrot.slane %v2698_v8, 1  ;;  %v2090_v62 = vpop.f32.mrb[39].mxu1  ;;  %v2141_v60 = vsel %vm949_vm0, %v2135_v50, %v2136_v23  ;;  %v2150_v48 = vsel %vm3604_vm4, 0.0, %v2142_v14  ;;  %v1440_v26 = vrot.slane %v4281_v54, 7 }
 0x4d9   : > { %v2177_v43 = vadd.f32 %v2169_v53, %v1467_v38  ;;  %v2157_v32 = vadd.f32 %v2143_v4, %v2125_v6  ;;  %v2111_v36 = vsel %vm916_vm1, %v2101_v40, %v2102_v9  ;;  %v2137_v30 = vrot.slane %v2090_v62, 1 }
 0x4da   : > { %v2126_v12 = vadd.f32 %v2111_v36, %v1967_v3  ;;  %v1971_v42 = vpop.f32.mrb[64].mxu0  ;;  %v4304_v20 = vsel %vm949_vm0, %v2138_v22, %v2131_v0  ;;  %v1417_v11 = vrot.slane %v4296_v31, 1  ;;  %v1443_v55 = vsel %vm916_vm1, %v1439_v29, %v1440_v26 }
 0x4db   : > { %2193 = vst [vmem:[%s3859_s10 + $0x18] sm:$0xff] %v2177_v43  ;;  %v2170_v38 = vadd.f32 %v4269_v44, %v2157_v32  ;;  %v2140_v40 = vsel %vm949_vm0, %v2136_v23, %v2137_v30  ;;  %v2103_v1 = vrot.slane %v1971_v42, 7  ;;  %v1973_v37 = vpop.f32.mrb[65].mxu0  ;;  %v2139_v13 = vsel %vm949_vm0, %v2137_v30, %v2138_v22 }
 0x4dc   : > { %v2158_v4 = vadd.f32 %v2150_v48, %v2126_v12  ;;  %v1441_v23 = vrot.slane %v4296_v31, 7  ;;  %v1470_v53 = vmax.f32 %v4208_v46, %v1462_v33  ;;  %v1463_v3 = vmax.f32 %v1444_v56, %v1431_v61 }
 0x4dd   : > { %v2178_v0 = vadd.f32 %v2170_v38, %v1468_v49  ;;  %v2110_v45 = vsel %vm916_vm1, %v2102_v9, %v2103_v1  ;;  %v1418_v29 = vsel %vm949_vm0, %v1416_v2, %v1417_v11  ;;  %v2152_v46 = vsel %vm3630_vm6, 0.0, %v2140_v40 }
 0x4de   : > { %v2171_v39 = vadd.f32 %v4269_v44, %v2158_v4  ;;  %v2119_v50 = vsel %vm3613_vm5, 0.0, %v2110_v45  ;;  %v1977_v52 = vpop.f32.mrb[66].mxu0  ;;  %v1449_v24 = vsel %vm916_vm1, %v1441_v23, %v1434_v35  ;;  %v1456_v62 = vsel %vm3639_vm7, -inf, %v1443_v55 }
 0x4df   : > { %2194 = vst [vmem:[%s3859_s10 + $0x28] sm:$0xff] %v2178_v0  ;;  %v2127_v7 = vadd.f32 %v2119_v50, %v1973_v37  ;;  %v2104_v49 = vrot.slane %v1977_v52, 7  ;;  %v1979_v63 = vpop.f32.mrb[67].mxu0  ;;  %v1425_v35 = vsel %vm949_vm0, %v1417_v11, %v1410_v5  ;;  %v1424_v2 = vsel %vm949_vm0, %v1410_v5, %v1411_v17 }
 0x4e0   : > { %v2179_v28 = vadd.f32 %v2171_v39, %v1469_v27  ;;  %v1450_v36 = vsel %vm3648_vm8, -inf, %v1449_v24  ;;  %v1471_v30 = vmax.f32 %v4219_v41, %v1463_v3  ;;  %v1464_v48 = vmax.f32 %v1456_v62, %v1418_v29 }
 0x4e1   : > { %v2159_v6 = vadd.f32 %v2141_v60, %v2127_v7  ;;  %v2109_v9 = vsel %vm916_vm1, %v2103_v1, %v2104_v49  ;;  %v1433_v40 = vsel %vm3660_vm9, -inf, %v1425_v35  ;;  %v1442_v1 = vsel %vm916_vm1, %v1440_v26, %v1441_v23 }
 0x4e2   : > { %2195 = vst [vmem:[%s3859_s10 + $0x38] sm:$0xff] %v2179_v28  ;;  %v2128_v14 = vadd.f32 %v2109_v9, %v1979_v63  ;;  %v1983_v8 = vpop.f32.mrb[68].mxu0  ;;  %v1458_v0 = vmax.f32 %v1450_v36, %v1424_v2  ;;  %v1465_v33 = vmax.f32 %v1442_v1, %v1433_v40  ;;  %v2154_v21 = vsel %vm3660_vm9, 0.0, %v4304_v20 }
 0x4e3   : > { %v2172_v19 = vadd.f32 %v4269_v44, %v2159_v6  ;;  %v2105_v22 = vrot.slane %v1983_v8, 7  ;;  %v1985_v60 = vpop.f32.mrb[69].mxu0 }
 0x4e4   : > { %v2160_v43 = vadd.f32 %v2152_v46, %v2128_v14  ;;  %v1473_v15 = vmax.f32 %v4296_v31, %v1465_v33  ;;  %v1466_v52 = vmax.f32 %v4179_v16, %v1458_v0 }
 0x4e5   : > { %v2180_v32 = vadd.f32 %v2172_v19, %v1470_v53  ;;  %v2108_v51 = vsel %vm916_vm1, %v2104_v49, %v2105_v22 }
 0x4e6   : > { %v2173_v12 = vadd.f32 %v4269_v44, %v2160_v43  ;;  %v2121_v42 = vsel %vm3639_vm7, 0.0, %v2108_v51  ;;  %v1989_v10 = vpop.f32.mrb[70].mxu0 }
 0x4e7   : > { %2196 = vst [vmem:[%s3859_s10 + $0x48] sm:$0xff] %v2180_v32  ;;  %v2129_v38 = vadd.f32 %v2121_v42, %v1985_v60  ;;  %v2106_v17 = vrot.slane %v1989_v10, 7  ;;  %v1991_v37 = vpop.f32.mrb[71].mxu0 }
 0x4e8   : > { %v2181_v4 = vadd.f32 %v2173_v12, %v1471_v30 }
 0x4e9   : > { %v2161_v47 = vadd.f32 %v2139_v13, %v2129_v38  ;;  %v2114_v41 = vsel %vm916_vm1, %v2106_v17, %v2099_v57  ;;  %v2107_v59 = vsel %vm916_vm1, %v2105_v22, %v2106_v17  ;;  %v1472_v13 = vmax.f32 %v4281_v54, %v1464_v48 }
 0x4ea   : > { %2197 = vst [vmem:[%s3859_s10 + $0x58] sm:$0xff] %v2181_v4  ;;  %v2115_v27 = vsel %vm3648_vm8, 0.0, %v2114_v41  ;;  %v2130_v45 = vadd.f32 %v2107_v59, %v1991_v37 }
 0x4eb   : > { %v2174_v18 = vadd.f32 %v4269_v44, %v2161_v47  ;;  %v2123_v23 = vadd.f32 %v2115_v27, %v4216_v34 }
 0x4ec   : > { %v2162_v57 = vadd.f32 %v2154_v21, %v2130_v45 }
 0x4ed   : > { %v2182_v26 = vadd.f32 %v2174_v18, %v1472_v13  ;;  %v2155_v39 = vadd.f32 %v4241_v58, %v2123_v23 }
 0x4ee   : > { %v2175_v50 = vadd.f32 %v4269_v44, %v2162_v57 }
 0x4ef   : > { %2198 = vst [vmem:[%s3859_s10 + $0x68] sm:$0xff] %v2182_v26  ;;  %v2168_v54 = vadd.f32 %v4269_v44, %v2155_v39 }
 0x4f0   : > { %v2183_v7 = vadd.f32 %v2175_v50, %v1473_v15 }
 0x4f1   : > { %v2176_v49 = vadd.f32 %v2168_v54, %v1466_v52 }
 0x4f2   : > { %2199 = vst [vmem:[%s3859_s10 + $0x78] sm:$0xff] %v2183_v7 }
 0x4f3   : > { %2192 = vst [vmem:[%s3859_s10 + $0x8] sm:$0xff] %v2176_v49 }
 0x4f4 PF: > { %s14_s15 = sadd.s32 1, %s3036_s15  }
 0x4f5   : > { %p11_p4 = scmp.ge.s32.totalorder %s14_s15, 4  }
 0x4f7   :  { %13 = sbr.rel (!%p11_p4) target bundleno = 1 (0x1), region = 69 }

</bundles_post_ra>
